<compile_context>
chip_gen: v6e
topology: v6e:2x2x1
jax: 0.10.0
libtpu: 0.0.40
codegen_flags: <defaults>
</compile_context>

<pallas_src>
import math

import jax
import jax.numpy as jnp
from jax.experimental import pallas as pl
from jax.experimental.pallas import tpu as pltpu

# ---- small, module-consistent config -------------------------------------
B = 2          # batch
T = 8          # sequence length
C = 32         # n_embd
NH = 4         # n_head
HD = C // NH   # head dim
NT = B * T     # flattened token count
LN_EPS = 1e-5  # torch.nn.LayerNorm default


# ---- fused Block kernel (single invocation, whole batch) -------------------
def block_kernel(x_ref, pv_ref, w_ref, bqkv_ref, mask_ref, o_ref):
    x = x_ref[...].astype(jnp.float32)            # (NT, C)
    pv = pv_ref[...]                              # (5, C): g1,b1,g2,b2,bproj
    w = w_ref[...]                                # (C, 4C): [Wqkv(scaled) | Wproj]
    bqkv = bqkv_ref[...]                          # (1, 3C), q-part pre-scaled
    mask = mask_ref[...]                          # (NT, NT) additive bias

    g1, b1 = pv[0:1, :], pv[1:2, :]
    g2, b2 = pv[2:3, :], pv[3:4, :]
    bproj = pv[4:5, :]
    w_qkv = w[:, 0:3 * C]                         # (C, 3C)
    w_out = w[:, 3 * C:4 * C]                     # (C, C)

    def layernorm(h, g, b):
        mu = jnp.mean(h, axis=-1, keepdims=True)
        var = jnp.mean((h - mu) ** 2, axis=-1, keepdims=True)
        return (h - mu) * jax.lax.rsqrt(var + LN_EPS) * g + b

    def attention(h):                             # h: (NT, C)
        # one fused QKV matmul (96-wide lane output) + one broadcast bias add
        qkv = jnp.dot(h, w_qkv, preferred_element_type=jnp.float32) + bqkv
        out = None
        for hd in range(NH):                      # unrolled, NH = 4
            q = qkv[:, 0 * C + hd * HD:0 * C + (hd + 1) * HD]      # (NT, HD)
            k = qkv[:, 1 * C + hd * HD:1 * C + (hd + 1) * HD]
            v = qkv[:, 2 * C + hd * HD:2 * C + (hd + 1) * HD]
            s = jnp.einsum('nd,md->nm', q, k,
                           preferred_element_type=jnp.float32)     # (NT, NT)
            s = s + mask                                            # causal/block-diag
            s = s - jnp.max(s, axis=-1, keepdims=True)
            p = jnp.exp(s)
            p = p * pl.reciprocal(jnp.sum(p, axis=-1, keepdims=True),
                                  approx=True)
            y = jnp.dot(p, v, preferred_element_type=jnp.float32)  # (NT, HD)
            # per-head projection accumulated straight into (NT, C)
            proj = jnp.dot(y, w_out[hd * HD:(hd + 1) * HD, :],
                           preferred_element_type=jnp.float32)
            out = proj if out is None else out + proj
        return out + bproj

    x1 = x + attention(layernorm(x, g1, b1))
    x2 = x1 + attention(layernorm(x1, g2, b2))
    o_ref[...] = x2.astype(o_ref.dtype)


def block_forward(x, params):
    """x: (B, T, C) float32. params in the original (fused) layout."""
    g1, b1, g2, b2, wqkv, bqkv, wproj, bproj = params

    # ---- host-side (free) restructuring -----------------------------------
    x_flat = x.reshape(NT, C)

    # fold the 1/sqrt(HD) attention scale into the Q columns of Wqkv / bqkv
    scale = 1.0 / math.sqrt(HD)
    col_scale = jnp.concatenate(
        [jnp.full((1, C), scale, jnp.float32),
         jnp.ones((1, 2 * C), jnp.float32)], axis=1)                # (1, 3C)
    wqkv_s = (wqkv * col_scale).astype(jnp.float32)                 # (C, 3C)
    bqkv_s = (bqkv * col_scale).astype(jnp.float32)                 # (1, 3C)

    # pack weights into one lane-dense (C, 4C) = (32, 128) slab
    w_pack = jnp.concatenate([wqkv_s, wproj.astype(jnp.float32)], axis=1)
    # pack all per-channel vectors into one (5, C) array
    p_pack = jnp.concatenate([g1, b1, g2, b2, bproj], axis=0).astype(jnp.float32)

    # block-diagonal causal additive mask over the flattened (B*T) token axis
    row = jnp.arange(NT, dtype=jnp.int32)[:, None]
    col = jnp.arange(NT, dtype=jnp.int32)[None, :]
    allowed = (row // T == col // T) & (row >= col)
    mask_bias = jnp.where(allowed, 0.0, -1e30).astype(jnp.float32)  # (NT, NT)

    full = lambda shape: pl.BlockSpec(shape, lambda i: (0,) * len(shape))

    out_flat = pl.pallas_call(
        block_kernel,
        out_shape=jax.ShapeDtypeStruct((NT, C), x.dtype),
        grid=(1,),                                     # single invocation
        in_specs=[
            full((NT, C)),                             # x (flattened)
            full((5, C)),                              # g1,b1,g2,b2,bproj
            full((C, 4 * C)),                          # [Wqkv(scaled) | Wproj]
            full((1, 3 * C)),                          # fused QKV bias (scaled)
            full((NT, NT)),                            # additive causal mask
        ],
        out_specs=full((NT, C)),
        compiler_params=pltpu.CompilerParams(
            dimension_semantics=("arbitrary",)),
    )(x_flat, p_pack, w_pack, bqkv_s, mask_bias)

    return out_flat.reshape(B, T, C)


# ---- pure-JAX reference (for correctness check) ---------------------------
def block_ref(x, params):
    g1, b1, g2, b2, wqkv, bqkv, wproj, bproj = params

    def ln(h, g, b):
        mu = jnp.mean(h, axis=-1, keepdims=True)
        var = jnp.mean((h - mu) ** 2, axis=-1, keepdims=True)
        return (h - mu) / jnp.sqrt(var + LN_EPS) * g[0] + b[0]

    def attn(h):
        qkv = h @ wqkv + bqkv[0]
        q, k, v = jnp.split(qkv, 3, axis=-1)
        q = q.reshape(B, T, NH, HD).transpose(0, 2, 1, 3)
        k = k.reshape(B, T, NH, HD).transpose(0, 2, 1, 3)
        v = v.reshape(B, T, NH, HD).transpose(0, 2, 1, 3)
        s = jnp.einsum("bhqd,bhkd->bhqk", q, k) / math.sqrt(HD)
        m = jnp.tril(jnp.ones((T, T), dtype=bool))
        s = jnp.where(m, s, -1e30)
        p = jax.nn.softmax(s, axis=-1)
        y = jnp.einsum("bhqk,bhkd->bhqd", p, v)
        y = y.transpose(0, 2, 1, 3).reshape(B, T, C)
        return y @ wproj + bproj[0]

    x1 = x + attn(ln(x, g1, b1))
    x2 = x1 + attn(ln(x1, g2, b2))
    return x2


if __name__ == "__main__":
    key = jax.random.PRNGKey(0)
    ks = jax.random.split(key, 6)

    x = jax.random.normal(ks[0], (B, T, C), dtype=jnp.float32)

    # deterministic synthetic parameters (shapes match the module's __init__)
    g1 = jnp.ones((1, C), jnp.float32)
    b1 = jnp.zeros((1, C), jnp.float32)
    g2 = jnp.ones((1, C), jnp.float32) * 1.1
    b2 = jnp.zeros((1, C), jnp.float32) + 0.05
    wqkv = jax.random.normal(ks[1], (C, 3 * C), jnp.float32) * 0.02
    bqkv = jax.random.normal(ks[2], (1, 3 * C), jnp.float32) * 0.01
    wproj = jax.random.normal(ks[3], (C, C), jnp.float32) * 0.02
    bproj = jax.random.normal(ks[4], (1, C), jnp.float32) * 0.01
    params = (g1, b1, g2, b2, wqkv, bqkv, wproj, bproj)

    out = block_forward(x, params)
    out = jax.block_until_ready(out)

    ref = block_ref(x, params)
    assert out.shape == (B, T, C)
    # tolerance relaxed vs 1e-4 because the softmax denominator uses the
    # approximate EUP reciprocal (pl.reciprocal(approx=True)).
    assert jnp.allclose(out, ref, atol=1e-3, rtol=1e-3), "mismatch vs reference"

    print("KERNEL_OK")
</pallas_src>

<mosaic_0001>
module attributes {stable_mosaic.version = 11 : i64} {
  func.func @block_kernel(%arg0: i32, %arg1: memref<16x32xf32, #tpu.memory_space<vmem>>, %arg2: memref<5x32xf32, #tpu.memory_space<vmem>>, %arg3: memref<32x128xf32, #tpu.memory_space<vmem>>, %arg4: memref<1x96xf32, #tpu.memory_space<vmem>>, %arg5: memref<16x16xf32, #tpu.memory_space<vmem>>, %arg6: memref<16x32xf32, #tpu.memory_space<vmem>>) attributes {dimension_semantics = [#tpu.dimension_semantics<arbitrary>], iteration_bounds = array<i64: 1>, scalar_prefetch = 0 : i64, scratch_operands = 0 : i64, tpu.core_type = #tpu.core_type<tc>, window_params = [{pipeline_mode = #tpu.pipeline_mode<synchronous>, transform_indices = @transform_0, window_bounds = array<i64: 16, 32>}, {pipeline_mode = #tpu.pipeline_mode<synchronous>, transform_indices = @transform_1, window_bounds = array<i64: 5, 32>}, {pipeline_mode = #tpu.pipeline_mode<synchronous>, transform_indices = @transform_2, window_bounds = array<i64: 32, 128>}, {pipeline_mode = #tpu.pipeline_mode<synchronous>, transform_indices = @transform_3, window_bounds = array<i64: 1, 96>}, {pipeline_mode = #tpu.pipeline_mode<synchronous>, transform_indices = @transform_4, window_bounds = array<i64: 16, 16>}, {pipeline_mode = #tpu.pipeline_mode<synchronous>, transform_indices = @transform_5, window_bounds = array<i64: 16, 32>}]} {
    %c0 = arith.constant 0 : index
    %c0_0 = arith.constant 0 : index
    %0 = vector.load %arg1[%c0, %c0_0] : memref<16x32xf32, #tpu.memory_space<vmem>>, vector<16x32xf32>
    %c0_1 = arith.constant 0 : index
    %c0_2 = arith.constant 0 : index
    %1 = vector.load %arg2[%c0_1, %c0_2] : memref<5x32xf32, #tpu.memory_space<vmem>>, vector<5x32xf32>
    %c0_3 = arith.constant 0 : index
    %c0_4 = arith.constant 0 : index
    %2 = vector.load %arg3[%c0_3, %c0_4] : memref<32x128xf32, #tpu.memory_space<vmem>>, vector<32x128xf32>
    %c0_5 = arith.constant 0 : index
    %c0_6 = arith.constant 0 : index
    %3 = vector.load %arg4[%c0_5, %c0_6] : memref<1x96xf32, #tpu.memory_space<vmem>>, vector<1x96xf32>
    %c0_7 = arith.constant 0 : index
    %c0_8 = arith.constant 0 : index
    %4 = vector.load %arg5[%c0_7, %c0_8] : memref<16x16xf32, #tpu.memory_space<vmem>>, vector<16x16xf32>
    %5 = vector.extract_strided_slice %1 {offsets = [0, 0], sizes = [1, 32], strides = [1, 1]} : vector<5x32xf32> to vector<1x32xf32>
    %6 = vector.extract_strided_slice %1 {offsets = [1, 0], sizes = [1, 32], strides = [1, 1]} : vector<5x32xf32> to vector<1x32xf32>
    %7 = vector.extract_strided_slice %1 {offsets = [2, 0], sizes = [1, 32], strides = [1, 1]} : vector<5x32xf32> to vector<1x32xf32>
    %8 = vector.extract_strided_slice %1 {offsets = [3, 0], sizes = [1, 32], strides = [1, 1]} : vector<5x32xf32> to vector<1x32xf32>
    %9 = vector.extract_strided_slice %1 {offsets = [4, 0], sizes = [1, 32], strides = [1, 1]} : vector<5x32xf32> to vector<1x32xf32>
    %10 = vector.extract_strided_slice %2 {offsets = [0, 0], sizes = [32, 96], strides = [1, 1]} : vector<32x128xf32> to vector<32x96xf32>
    %11 = vector.extract_strided_slice %2 {offsets = [0, 96], sizes = [32, 32], strides = [1, 1]} : vector<32x128xf32> to vector<32x32xf32>
    %cst = arith.constant dense<0.000000e+00> : vector<16xf32>
    %12 = vector.multi_reduction <add>, %0, %cst [1] : vector<16x32xf32> to vector<16xf32>
    %13 = vector.shape_cast %12 : vector<16xf32> to vector<16x1xf32>
    %cst_9 = arith.constant 3.200000e+01 : f32
    %14 = vector.broadcast %cst_9 : f32 to vector<16x1xf32>
    %15 = arith.divf %13, %14 : vector<16x1xf32>
    %16 = vector.broadcast %15 : vector<16x1xf32> to vector<16x32xf32>
    %17 = arith.subf %0, %16 : vector<16x32xf32>
    %18 = arith.mulf %17, %17 : vector<16x32xf32>
    %cst_10 = arith.constant dense<0.000000e+00> : vector<16xf32>
    %19 = vector.multi_reduction <add>, %18, %cst_10 [1] : vector<16x32xf32> to vector<16xf32>
    %20 = vector.shape_cast %19 : vector<16xf32> to vector<16x1xf32>
    %cst_11 = arith.constant 3.200000e+01 : f32
    %21 = vector.broadcast %cst_11 : f32 to vector<16x1xf32>
    %22 = arith.divf %20, %21 : vector<16x1xf32>
    %23 = vector.broadcast %15 : vector<16x1xf32> to vector<16x32xf32>
    %24 = arith.subf %0, %23 : vector<16x32xf32>
    %cst_12 = arith.constant 9.99999974E-6 : f32
    %25 = vector.broadcast %cst_12 : f32 to vector<16x1xf32>
    %26 = arith.addf %22, %25 : vector<16x1xf32>
    %27 = math.rsqrt %26 : vector<16x1xf32>
    %28 = vector.broadcast %27 : vector<16x1xf32> to vector<16x32xf32>
    %29 = arith.mulf %24, %28 : vector<16x32xf32>
    %30 = vector.broadcast %5 : vector<1x32xf32> to vector<16x32xf32>
    %31 = arith.mulf %29, %30 : vector<16x32xf32>
    %32 = vector.broadcast %6 : vector<1x32xf32> to vector<16x32xf32>
    %33 = arith.addf %31, %32 : vector<16x32xf32>
    %cst_13 = arith.constant dense<0.000000e+00> : vector<16x96xf32>
    %34 = tpu.matmul %33, %10, %cst_13 {dimension_numbers = #tpu.dot_dimension_numbers<[1], [0], [0], [1], [0, 0, 1, 1], [], []>} : vector<16x32xf32>, vector<32x96xf32>, vector<16x96xf32> -> vector<16x96xf32>
    %35 = vector.broadcast %3 : vector<1x96xf32> to vector<16x96xf32>
    %36 = arith.addf %34, %35 : vector<16x96xf32>
    %37 = vector.extract_strided_slice %36 {offsets = [0, 0], sizes = [16, 8], strides = [1, 1]} : vector<16x96xf32> to vector<16x8xf32>
    %38 = vector.extract_strided_slice %36 {offsets = [0, 32], sizes = [16, 8], strides = [1, 1]} : vector<16x96xf32> to vector<16x8xf32>
    %39 = vector.extract_strided_slice %36 {offsets = [0, 64], sizes = [16, 8], strides = [1, 1]} : vector<16x96xf32> to vector<16x8xf32>
    "tpu.trace_start"() <{level = 10 : i32, message = "nd,md->nm"}> : () -> ()
    %cst_14 = arith.constant dense<0.000000e+00> : vector<16x16xf32>
    %40 = tpu.matmul %37, %38, %cst_14 {dimension_numbers = #tpu.dot_dimension_numbers<[1], [1], [0], [0], [0, 0, 1, 0], [], []>} : vector<16x8xf32>, vector<16x8xf32>, vector<16x16xf32> -> vector<16x16xf32>
    "tpu.trace_stop"() : () -> ()
    %41 = arith.addf %40, %4 : vector<16x16xf32>
    %cst_15 = arith.constant dense<0xFF800000> : vector<16xf32>
    %42 = vector.multi_reduction <maximumf>, %41, %cst_15 [1] : vector<16x16xf32> to vector<16xf32>
    %43 = vector.shape_cast %42 : vector<16xf32> to vector<16x1xf32>
    %44 = vector.broadcast %43 : vector<16x1xf32> to vector<16x16xf32>
    %45 = arith.subf %41, %44 : vector<16x16xf32>
    %46 = math.exp %45 : vector<16x16xf32>
    %cst_16 = arith.constant dense<0.000000e+00> : vector<16xf32>
    %47 = vector.multi_reduction <add>, %46, %cst_16 [1] : vector<16x16xf32> to vector<16xf32>
    %48 = vector.shape_cast %47 : vector<16xf32> to vector<16x1xf32>
    %49 = tpu.reciprocal %48 {approx = true} : vector<16x1xf32> -> vector<16x1xf32>
    %50 = vector.broadcast %49 : vector<16x1xf32> to vector<16x16xf32>
    %51 = arith.mulf %46, %50 : vector<16x16xf32>
    %cst_17 = arith.constant dense<0.000000e+00> : vector<16x8xf32>
    %52 = tpu.matmul %51, %39, %cst_17 {dimension_numbers = #tpu.dot_dimension_numbers<[1], [0], [0], [1], [0, 0, 1, 1], [], []>} : vector<16x16xf32>, vector<16x8xf32>, vector<16x8xf32> -> vector<16x8xf32>
    %53 = vector.extract_strided_slice %11 {offsets = [0, 0], sizes = [8, 32], strides = [1, 1]} : vector<32x32xf32> to vector<8x32xf32>
    %cst_18 = arith.constant dense<0.000000e+00> : vector<16x32xf32>
    %54 = tpu.matmul %52, %53, %cst_18 {dimension_numbers = #tpu.dot_dimension_numbers<[1], [0], [0], [1], [0, 0, 1, 1], [], []>} : vector<16x8xf32>, vector<8x32xf32>, vector<16x32xf32> -> vector<16x32xf32>
    %55 = vector.extract_strided_slice %36 {offsets = [0, 8], sizes = [16, 8], strides = [1, 1]} : vector<16x96xf32> to vector<16x8xf32>
    %56 = vector.extract_strided_slice %36 {offsets = [0, 40], sizes = [16, 8], strides = [1, 1]} : vector<16x96xf32> to vector<16x8xf32>
    %57 = vector.extract_strided_slice %36 {offsets = [0, 72], sizes = [16, 8], strides = [1, 1]} : vector<16x96xf32> to vector<16x8xf32>
    "tpu.trace_start"() <{level = 10 : i32, message = "nd,md->nm"}> : () -> ()
    %cst_19 = arith.constant dense<0.000000e+00> : vector<16x16xf32>
    %58 = tpu.matmul %55, %56, %cst_19 {dimension_numbers = #tpu.dot_dimension_numbers<[1], [1], [0], [0], [0, 0, 1, 0], [], []>} : vector<16x8xf32>, vector<16x8xf32>, vector<16x16xf32> -> vector<16x16xf32>
    "tpu.trace_stop"() : () -> ()
    %59 = arith.addf %58, %4 : vector<16x16xf32>
    %cst_20 = arith.constant dense<0xFF800000> : vector<16xf32>
    %60 = vector.multi_reduction <maximumf>, %59, %cst_20 [1] : vector<16x16xf32> to vector<16xf32>
    %61 = vector.shape_cast %60 : vector<16xf32> to vector<16x1xf32>
    %62 = vector.broadcast %61 : vector<16x1xf32> to vector<16x16xf32>
    %63 = arith.subf %59, %62 : vector<16x16xf32>
    %64 = math.exp %63 : vector<16x16xf32>
    %cst_21 = arith.constant dense<0.000000e+00> : vector<16xf32>
    %65 = vector.multi_reduction <add>, %64, %cst_21 [1] : vector<16x16xf32> to vector<16xf32>
    %66 = vector.shape_cast %65 : vector<16xf32> to vector<16x1xf32>
    %67 = tpu.reciprocal %66 {approx = true} : vector<16x1xf32> -> vector<16x1xf32>
    %68 = vector.broadcast %67 : vector<16x1xf32> to vector<16x16xf32>
    %69 = arith.mulf %64, %68 : vector<16x16xf32>
    %cst_22 = arith.constant dense<0.000000e+00> : vector<16x8xf32>
    %70 = tpu.matmul %69, %57, %cst_22 {dimension_numbers = #tpu.dot_dimension_numbers<[1], [0], [0], [1], [0, 0, 1, 1], [], []>} : vector<16x16xf32>, vector<16x8xf32>, vector<16x8xf32> -> vector<16x8xf32>
    %71 = vector.extract_strided_slice %11 {offsets = [8, 0], sizes = [8, 32], strides = [1, 1]} : vector<32x32xf32> to vector<8x32xf32>
    %cst_23 = arith.constant dense<0.000000e+00> : vector<16x32xf32>
    %72 = tpu.matmul %70, %71, %cst_23 {dimension_numbers = #tpu.dot_dimension_numbers<[1], [0], [0], [1], [0, 0, 1, 1], [], []>} : vector<16x8xf32>, vector<8x32xf32>, vector<16x32xf32> -> vector<16x32xf32>
    %73 = arith.addf %54, %72 : vector<16x32xf32>
    %74 = vector.extract_strided_slice %36 {offsets = [0, 16], sizes = [16, 8], strides = [1, 1]} : vector<16x96xf32> to vector<16x8xf32>
    %75 = vector.extract_strided_slice %36 {offsets = [0, 48], sizes = [16, 8], strides = [1, 1]} : vector<16x96xf32> to vector<16x8xf32>
    %76 = vector.extract_strided_slice %36 {offsets = [0, 80], sizes = [16, 8], strides = [1, 1]} : vector<16x96xf32> to vector<16x8xf32>
    "tpu.trace_start"() <{level = 10 : i32, message = "nd,md->nm"}> : () -> ()
    %cst_24 = arith.constant dense<0.000000e+00> : vector<16x16xf32>
    %77 = tpu.matmul %74, %75, %cst_24 {dimension_numbers = #tpu.dot_dimension_numbers<[1], [1], [0], [0], [0, 0, 1, 0], [], []>} : vector<16x8xf32>, vector<16x8xf32>, vector<16x16xf32> -> vector<16x16xf32>
    "tpu.trace_stop"() : () -> ()
    %78 = arith.addf %77, %4 : vector<16x16xf32>
    %cst_25 = arith.constant dense<0xFF800000> : vector<16xf32>
    %79 = vector.multi_reduction <maximumf>, %78, %cst_25 [1] : vector<16x16xf32> to vector<16xf32>
    %80 = vector.shape_cast %79 : vector<16xf32> to vector<16x1xf32>
    %81 = vector.broadcast %80 : vector<16x1xf32> to vector<16x16xf32>
    %82 = arith.subf %78, %81 : vector<16x16xf32>
    %83 = math.exp %82 : vector<16x16xf32>
    %cst_26 = arith.constant dense<0.000000e+00> : vector<16xf32>
    %84 = vector.multi_reduction <add>, %83, %cst_26 [1] : vector<16x16xf32> to vector<16xf32>
    %85 = vector.shape_cast %84 : vector<16xf32> to vector<16x1xf32>
    %86 = tpu.reciprocal %85 {approx = true} : vector<16x1xf32> -> vector<16x1xf32>
    %87 = vector.broadcast %86 : vector<16x1xf32> to vector<16x16xf32>
    %88 = arith.mulf %83, %87 : vector<16x16xf32>
    %cst_27 = arith.constant dense<0.000000e+00> : vector<16x8xf32>
    %89 = tpu.matmul %88, %76, %cst_27 {dimension_numbers = #tpu.dot_dimension_numbers<[1], [0], [0], [1], [0, 0, 1, 1], [], []>} : vector<16x16xf32>, vector<16x8xf32>, vector<16x8xf32> -> vector<16x8xf32>
    %90 = vector.extract_strided_slice %11 {offsets = [16, 0], sizes = [8, 32], strides = [1, 1]} : vector<32x32xf32> to vector<8x32xf32>
    %cst_28 = arith.constant dense<0.000000e+00> : vector<16x32xf32>
    %91 = tpu.matmul %89, %90, %cst_28 {dimension_numbers = #tpu.dot_dimension_numbers<[1], [0], [0], [1], [0, 0, 1, 1], [], []>} : vector<16x8xf32>, vector<8x32xf32>, vector<16x32xf32> -> vector<16x32xf32>
    %92 = arith.addf %73, %91 : vector<16x32xf32>
    %93 = vector.extract_strided_slice %36 {offsets = [0, 24], sizes = [16, 8], strides = [1, 1]} : vector<16x96xf32> to vector<16x8xf32>
    %94 = vector.extract_strided_slice %36 {offsets = [0, 56], sizes = [16, 8], strides = [1, 1]} : vector<16x96xf32> to vector<16x8xf32>
    %95 = vector.extract_strided_slice %36 {offsets = [0, 88], sizes = [16, 8], strides = [1, 1]} : vector<16x96xf32> to vector<16x8xf32>
    "tpu.trace_start"() <{level = 10 : i32, message = "nd,md->nm"}> : () -> ()
    %cst_29 = arith.constant dense<0.000000e+00> : vector<16x16xf32>
    %96 = tpu.matmul %93, %94, %cst_29 {dimension_numbers = #tpu.dot_dimension_numbers<[1], [1], [0], [0], [0, 0, 1, 0], [], []>} : vector<16x8xf32>, vector<16x8xf32>, vector<16x16xf32> -> vector<16x16xf32>
    "tpu.trace_stop"() : () -> ()
    %97 = arith.addf %96, %4 : vector<16x16xf32>
    %cst_30 = arith.constant dense<0xFF800000> : vector<16xf32>
    %98 = vector.multi_reduction <maximumf>, %97, %cst_30 [1] : vector<16x16xf32> to vector<16xf32>
    %99 = vector.shape_cast %98 : vector<16xf32> to vector<16x1xf32>
    %100 = vector.broadcast %99 : vector<16x1xf32> to vector<16x16xf32>
    %101 = arith.subf %97, %100 : vector<16x16xf32>
    %102 = math.exp %101 : vector<16x16xf32>
    %cst_31 = arith.constant dense<0.000000e+00> : vector<16xf32>
    %103 = vector.multi_reduction <add>, %102, %cst_31 [1] : vector<16x16xf32> to vector<16xf32>
    %104 = vector.shape_cast %103 : vector<16xf32> to vector<16x1xf32>
    %105 = tpu.reciprocal %104 {approx = true} : vector<16x1xf32> -> vector<16x1xf32>
    %106 = vector.broadcast %105 : vector<16x1xf32> to vector<16x16xf32>
    %107 = arith.mulf %102, %106 : vector<16x16xf32>
    %cst_32 = arith.constant dense<0.000000e+00> : vector<16x8xf32>
    %108 = tpu.matmul %107, %95, %cst_32 {dimension_numbers = #tpu.dot_dimension_numbers<[1], [0], [0], [1], [0, 0, 1, 1], [], []>} : vector<16x16xf32>, vector<16x8xf32>, vector<16x8xf32> -> vector<16x8xf32>
    %109 = vector.extract_strided_slice %11 {offsets = [24, 0], sizes = [8, 32], strides = [1, 1]} : vector<32x32xf32> to vector<8x32xf32>
    %cst_33 = arith.constant dense<0.000000e+00> : vector<16x32xf32>
    %110 = tpu.matmul %108, %109, %cst_33 {dimension_numbers = #tpu.dot_dimension_numbers<[1], [0], [0], [1], [0, 0, 1, 1], [], []>} : vector<16x8xf32>, vector<8x32xf32>, vector<16x32xf32> -> vector<16x32xf32>
    %111 = arith.addf %92, %110 : vector<16x32xf32>
    %112 = vector.broadcast %9 : vector<1x32xf32> to vector<16x32xf32>
    %113 = arith.addf %111, %112 : vector<16x32xf32>
    %114 = arith.addf %0, %113 : vector<16x32xf32>
    %cst_34 = arith.constant dense<0.000000e+00> : vector<16xf32>
    %115 = vector.multi_reduction <add>, %114, %cst_34 [1] : vector<16x32xf32> to vector<16xf32>
    %116 = vector.shape_cast %115 : vector<16xf32> to vector<16x1xf32>
    %cst_35 = arith.constant 3.200000e+01 : f32
    %117 = vector.broadcast %cst_35 : f32 to vector<16x1xf32>
    %118 = arith.divf %116, %117 : vector<16x1xf32>
    %119 = vector.broadcast %118 : vector<16x1xf32> to vector<16x32xf32>
    %120 = arith.subf %114, %119 : vector<16x32xf32>
    %121 = arith.mulf %120, %120 : vector<16x32xf32>
    %cst_36 = arith.constant dense<0.000000e+00> : vector<16xf32>
    %122 = vector.multi_reduction <add>, %121, %cst_36 [1] : vector<16x32xf32> to vector<16xf32>
    %123 = vector.shape_cast %122 : vector<16xf32> to vector<16x1xf32>
    %cst_37 = arith.constant 3.200000e+01 : f32
    %124 = vector.broadcast %cst_37 : f32 to vector<16x1xf32>
    %125 = arith.divf %123, %124 : vector<16x1xf32>
    %126 = vector.broadcast %118 : vector<16x1xf32> to vector<16x32xf32>
    %127 = arith.subf %114, %126 : vector<16x32xf32>
    %cst_38 = arith.constant 9.99999974E-6 : f32
    %128 = vector.broadcast %cst_38 : f32 to vector<16x1xf32>
    %129 = arith.addf %125, %128 : vector<16x1xf32>
    %130 = math.rsqrt %129 : vector<16x1xf32>
    %131 = vector.broadcast %130 : vector<16x1xf32> to vector<16x32xf32>
    %132 = arith.mulf %127, %131 : vector<16x32xf32>
    %133 = vector.broadcast %7 : vector<1x32xf32> to vector<16x32xf32>
    %134 = arith.mulf %132, %133 : vector<16x32xf32>
    %135 = vector.broadcast %8 : vector<1x32xf32> to vector<16x32xf32>
    %136 = arith.addf %134, %135 : vector<16x32xf32>
    %cst_39 = arith.constant dense<0.000000e+00> : vector<16x96xf32>
    %137 = tpu.matmul %136, %10, %cst_39 {dimension_numbers = #tpu.dot_dimension_numbers<[1], [0], [0], [1], [0, 0, 1, 1], [], []>} : vector<16x32xf32>, vector<32x96xf32>, vector<16x96xf32> -> vector<16x96xf32>
    %138 = vector.broadcast %3 : vector<1x96xf32> to vector<16x96xf32>
    %139 = arith.addf %137, %138 : vector<16x96xf32>
    %140 = vector.extract_strided_slice %139 {offsets = [0, 0], sizes = [16, 8], strides = [1, 1]} : vector<16x96xf32> to vector<16x8xf32>
    %141 = vector.extract_strided_slice %139 {offsets = [0, 32], sizes = [16, 8], strides = [1, 1]} : vector<16x96xf32> to vector<16x8xf32>
    %142 = vector.extract_strided_slice %139 {offsets = [0, 64], sizes = [16, 8], strides = [1, 1]} : vector<16x96xf32> to vector<16x8xf32>
    "tpu.trace_start"() <{level = 10 : i32, message = "nd,md->nm"}> : () -> ()
    %cst_40 = arith.constant dense<0.000000e+00> : vector<16x16xf32>
    %143 = tpu.matmul %140, %141, %cst_40 {dimension_numbers = #tpu.dot_dimension_numbers<[1], [1], [0], [0], [0, 0, 1, 0], [], []>} : vector<16x8xf32>, vector<16x8xf32>, vector<16x16xf32> -> vector<16x16xf32>
    "tpu.trace_stop"() : () -> ()
    %144 = arith.addf %143, %4 : vector<16x16xf32>
    %cst_41 = arith.constant dense<0xFF800000> : vector<16xf32>
    %145 = vector.multi_reduction <maximumf>, %144, %cst_41 [1] : vector<16x16xf32> to vector<16xf32>
    %146 = vector.shape_cast %145 : vector<16xf32> to vector<16x1xf32>
    %147 = vector.broadcast %146 : vector<16x1xf32> to vector<16x16xf32>
    %148 = arith.subf %144, %147 : vector<16x16xf32>
    %149 = math.exp %148 : vector<16x16xf32>
    %cst_42 = arith.constant dense<0.000000e+00> : vector<16xf32>
    %150 = vector.multi_reduction <add>, %149, %cst_42 [1] : vector<16x16xf32> to vector<16xf32>
    %151 = vector.shape_cast %150 : vector<16xf32> to vector<16x1xf32>
    %152 = tpu.reciprocal %151 {approx = true} : vector<16x1xf32> -> vector<16x1xf32>
    %153 = vector.broadcast %152 : vector<16x1xf32> to vector<16x16xf32>
    %154 = arith.mulf %149, %153 : vector<16x16xf32>
    %cst_43 = arith.constant dense<0.000000e+00> : vector<16x8xf32>
    %155 = tpu.matmul %154, %142, %cst_43 {dimension_numbers = #tpu.dot_dimension_numbers<[1], [0], [0], [1], [0, 0, 1, 1], [], []>} : vector<16x16xf32>, vector<16x8xf32>, vector<16x8xf32> -> vector<16x8xf32>
    %156 = vector.extract_strided_slice %11 {offsets = [0, 0], sizes = [8, 32], strides = [1, 1]} : vector<32x32xf32> to vector<8x32xf32>
    %cst_44 = arith.constant dense<0.000000e+00> : vector<16x32xf32>
    %157 = tpu.matmul %155, %156, %cst_44 {dimension_numbers = #tpu.dot_dimension_numbers<[1], [0], [0], [1], [0, 0, 1, 1], [], []>} : vector<16x8xf32>, vector<8x32xf32>, vector<16x32xf32> -> vector<16x32xf32>
    %158 = vector.extract_strided_slice %139 {offsets = [0, 8], sizes = [16, 8], strides = [1, 1]} : vector<16x96xf32> to vector<16x8xf32>
    %159 = vector.extract_strided_slice %139 {offsets = [0, 40], sizes = [16, 8], strides = [1, 1]} : vector<16x96xf32> to vector<16x8xf32>
    %160 = vector.extract_strided_slice %139 {offsets = [0, 72], sizes = [16, 8], strides = [1, 1]} : vector<16x96xf32> to vector<16x8xf32>
    "tpu.trace_start"() <{level = 10 : i32, message = "nd,md->nm"}> : () -> ()
    %cst_45 = arith.constant dense<0.000000e+00> : vector<16x16xf32>
    %161 = tpu.matmul %158, %159, %cst_45 {dimension_numbers = #tpu.dot_dimension_numbers<[1], [1], [0], [0], [0, 0, 1, 0], [], []>} : vector<16x8xf32>, vector<16x8xf32>, vector<16x16xf32> -> vector<16x16xf32>
    "tpu.trace_stop"() : () -> ()
    %162 = arith.addf %161, %4 : vector<16x16xf32>
    %cst_46 = arith.constant dense<0xFF800000> : vector<16xf32>
    %163 = vector.multi_reduction <maximumf>, %162, %cst_46 [1] : vector<16x16xf32> to vector<16xf32>
    %164 = vector.shape_cast %163 : vector<16xf32> to vector<16x1xf32>
    %165 = vector.broadcast %164 : vector<16x1xf32> to vector<16x16xf32>
    %166 = arith.subf %162, %165 : vector<16x16xf32>
    %167 = math.exp %166 : vector<16x16xf32>
    %cst_47 = arith.constant dense<0.000000e+00> : vector<16xf32>
    %168 = vector.multi_reduction <add>, %167, %cst_47 [1] : vector<16x16xf32> to vector<16xf32>
    %169 = vector.shape_cast %168 : vector<16xf32> to vector<16x1xf32>
    %170 = tpu.reciprocal %169 {approx = true} : vector<16x1xf32> -> vector<16x1xf32>
    %171 = vector.broadcast %170 : vector<16x1xf32> to vector<16x16xf32>
    %172 = arith.mulf %167, %171 : vector<16x16xf32>
    %cst_48 = arith.constant dense<0.000000e+00> : vector<16x8xf32>
    %173 = tpu.matmul %172, %160, %cst_48 {dimension_numbers = #tpu.dot_dimension_numbers<[1], [0], [0], [1], [0, 0, 1, 1], [], []>} : vector<16x16xf32>, vector<16x8xf32>, vector<16x8xf32> -> vector<16x8xf32>
    %174 = vector.extract_strided_slice %11 {offsets = [8, 0], sizes = [8, 32], strides = [1, 1]} : vector<32x32xf32> to vector<8x32xf32>
    %cst_49 = arith.constant dense<0.000000e+00> : vector<16x32xf32>
    %175 = tpu.matmul %173, %174, %cst_49 {dimension_numbers = #tpu.dot_dimension_numbers<[1], [0], [0], [1], [0, 0, 1, 1], [], []>} : vector<16x8xf32>, vector<8x32xf32>, vector<16x32xf32> -> vector<16x32xf32>
    %176 = arith.addf %157, %175 : vector<16x32xf32>
    %177 = vector.extract_strided_slice %139 {offsets = [0, 16], sizes = [16, 8], strides = [1, 1]} : vector<16x96xf32> to vector<16x8xf32>
    %178 = vector.extract_strided_slice %139 {offsets = [0, 48], sizes = [16, 8], strides = [1, 1]} : vector<16x96xf32> to vector<16x8xf32>
    %179 = vector.extract_strided_slice %139 {offsets = [0, 80], sizes = [16, 8], strides = [1, 1]} : vector<16x96xf32> to vector<16x8xf32>
    "tpu.trace_start"() <{level = 10 : i32, message = "nd,md->nm"}> : () -> ()
    %cst_50 = arith.constant dense<0.000000e+00> : vector<16x16xf32>
    %180 = tpu.matmul %177, %178, %cst_50 {dimension_numbers = #tpu.dot_dimension_numbers<[1], [1], [0], [0], [0, 0, 1, 0], [], []>} : vector<16x8xf32>, vector<16x8xf32>, vector<16x16xf32> -> vector<16x16xf32>
    "tpu.trace_stop"() : () -> ()
    %181 = arith.addf %180, %4 : vector<16x16xf32>
    %cst_51 = arith.constant dense<0xFF800000> : vector<16xf32>
    %182 = vector.multi_reduction <maximumf>, %181, %cst_51 [1] : vector<16x16xf32> to vector<16xf32>
    %183 = vector.shape_cast %182 : vector<16xf32> to vector<16x1xf32>
    %184 = vector.broadcast %183 : vector<16x1xf32> to vector<16x16xf32>
    %185 = arith.subf %181, %184 : vector<16x16xf32>
    %186 = math.exp %185 : vector<16x16xf32>
    %cst_52 = arith.constant dense<0.000000e+00> : vector<16xf32>
    %187 = vector.multi_reduction <add>, %186, %cst_52 [1] : vector<16x16xf32> to vector<16xf32>
    %188 = vector.shape_cast %187 : vector<16xf32> to vector<16x1xf32>
    %189 = tpu.reciprocal %188 {approx = true} : vector<16x1xf32> -> vector<16x1xf32>
    %190 = vector.broadcast %189 : vector<16x1xf32> to vector<16x16xf32>
    %191 = arith.mulf %186, %190 : vector<16x16xf32>
    %cst_53 = arith.constant dense<0.000000e+00> : vector<16x8xf32>
    %192 = tpu.matmul %191, %179, %cst_53 {dimension_numbers = #tpu.dot_dimension_numbers<[1], [0], [0], [1], [0, 0, 1, 1], [], []>} : vector<16x16xf32>, vector<16x8xf32>, vector<16x8xf32> -> vector<16x8xf32>
    %193 = vector.extract_strided_slice %11 {offsets = [16, 0], sizes = [8, 32], strides = [1, 1]} : vector<32x32xf32> to vector<8x32xf32>
    %cst_54 = arith.constant dense<0.000000e+00> : vector<16x32xf32>
    %194 = tpu.matmul %192, %193, %cst_54 {dimension_numbers = #tpu.dot_dimension_numbers<[1], [0], [0], [1], [0, 0, 1, 1], [], []>} : vector<16x8xf32>, vector<8x32xf32>, vector<16x32xf32> -> vector<16x32xf32>
    %195 = arith.addf %176, %194 : vector<16x32xf32>
    %196 = vector.extract_strided_slice %139 {offsets = [0, 24], sizes = [16, 8], strides = [1, 1]} : vector<16x96xf32> to vector<16x8xf32>
    %197 = vector.extract_strided_slice %139 {offsets = [0, 56], sizes = [16, 8], strides = [1, 1]} : vector<16x96xf32> to vector<16x8xf32>
    %198 = vector.extract_strided_slice %139 {offsets = [0, 88], sizes = [16, 8], strides = [1, 1]} : vector<16x96xf32> to vector<16x8xf32>
    "tpu.trace_start"() <{level = 10 : i32, message = "nd,md->nm"}> : () -> ()
    %cst_55 = arith.constant dense<0.000000e+00> : vector<16x16xf32>
    %199 = tpu.matmul %196, %197, %cst_55 {dimension_numbers = #tpu.dot_dimension_numbers<[1], [1], [0], [0], [0, 0, 1, 0], [], []>} : vector<16x8xf32>, vector<16x8xf32>, vector<16x16xf32> -> vector<16x16xf32>
    "tpu.trace_stop"() : () -> ()
    %200 = arith.addf %199, %4 : vector<16x16xf32>
    %cst_56 = arith.constant dense<0xFF800000> : vector<16xf32>
    %201 = vector.multi_reduction <maximumf>, %200, %cst_56 [1] : vector<16x16xf32> to vector<16xf32>
    %202 = vector.shape_cast %201 : vector<16xf32> to vector<16x1xf32>
    %203 = vector.broadcast %202 : vector<16x1xf32> to vector<16x16xf32>
    %204 = arith.subf %200, %203 : vector<16x16xf32>
    %205 = math.exp %204 : vector<16x16xf32>
    %cst_57 = arith.constant dense<0.000000e+00> : vector<16xf32>
    %206 = vector.multi_reduction <add>, %205, %cst_57 [1] : vector<16x16xf32> to vector<16xf32>
    %207 = vector.shape_cast %206 : vector<16xf32> to vector<16x1xf32>
    %208 = tpu.reciprocal %207 {approx = true} : vector<16x1xf32> -> vector<16x1xf32>
    %209 = vector.broadcast %208 : vector<16x1xf32> to vector<16x16xf32>
    %210 = arith.mulf %205, %209 : vector<16x16xf32>
    %cst_58 = arith.constant dense<0.000000e+00> : vector<16x8xf32>
    %211 = tpu.matmul %210, %198, %cst_58 {dimension_numbers = #tpu.dot_dimension_numbers<[1], [0], [0], [1], [0, 0, 1, 1], [], []>} : vector<16x16xf32>, vector<16x8xf32>, vector<16x8xf32> -> vector<16x8xf32>
    %212 = vector.extract_strided_slice %11 {offsets = [24, 0], sizes = [8, 32], strides = [1, 1]} : vector<32x32xf32> to vector<8x32xf32>
    %cst_59 = arith.constant dense<0.000000e+00> : vector<16x32xf32>
    %213 = tpu.matmul %211, %212, %cst_59 {dimension_numbers = #tpu.dot_dimension_numbers<[1], [0], [0], [1], [0, 0, 1, 1], [], []>} : vector<16x8xf32>, vector<8x32xf32>, vector<16x32xf32> -> vector<16x32xf32>
    %214 = arith.addf %195, %213 : vector<16x32xf32>
    %215 = vector.broadcast %9 : vector<1x32xf32> to vector<16x32xf32>
    %216 = arith.addf %214, %215 : vector<16x32xf32>
    %217 = arith.addf %114, %216 : vector<16x32xf32>
    %c0_60 = arith.constant 0 : index
    %c0_61 = arith.constant 0 : index
    %218 = vector.load %arg6[%c0_60, %c0_61] : memref<16x32xf32, #tpu.memory_space<vmem>>, vector<16x32xf32>
    tpu.vector_store %arg6[%c0_60, %c0_61], %217 {strides = array<i32>} : memref<16x32xf32, #tpu.memory_space<vmem>>, vector<16x32xf32>,
    return
  }
  func.func @transform_0(%arg0: i32) -> (i32, i32) {
    %c0_i32 = arith.constant 0 : i32
    %c0_i32_0 = arith.constant 0 : i32
    %c0_i32_1 = arith.constant 0 : i32
    return %c0_i32, %c0_i32_0 : i32, i32
  }
  func.func @transform_1(%arg0: i32) -> (i32, i32) {
    %c0_i32 = arith.constant 0 : i32
    %c0_i32_0 = arith.constant 0 : i32
    %c0_i32_1 = arith.constant 0 : i32
    return %c0_i32, %c0_i32_0 : i32, i32
  }
  func.func @transform_2(%arg0: i32) -> (i32, i32) {
    %c0_i32 = arith.constant 0 : i32
    %c0_i32_0 = arith.constant 0 : i32
    %c0_i32_1 = arith.constant 0 : i32
    return %c0_i32, %c0_i32_0 : i32, i32
  }
  func.func @transform_3(%arg0: i32) -> (i32, i32) {
    %c0_i32 = arith.constant 0 : i32
    %c0_i32_0 = arith.constant 0 : i32
    %c0_i32_1 = arith.constant 0 : i32
    return %c0_i32, %c0_i32_0 : i32, i32
  }
  func.func @transform_4(%arg0: i32) -> (i32, i32) {
    %c0_i32 = arith.constant 0 : i32
    %c0_i32_0 = arith.constant 0 : i32
    %c0_i32_1 = arith.constant 0 : i32
    return %c0_i32, %c0_i32_0 : i32, i32
  }
  func.func @transform_5(%arg0: i32) -> (i32, i32) {
    %c0_i32 = arith.constant 0 : i32
    %c0_i32_0 = arith.constant 0 : i32
    %c0_i32_1 = arith.constant 0 : i32
    return %c0_i32, %c0_i32_0 : i32, i32
  }
}

</mosaic_0001>

<bundles_post_ra>
// kernel: tpu_custom_call.1
= control target key start
LH: loop header
LB: loop body
LE: loop exit
PB: predicated region body
PF: predicated region fallthrough
CT: control target
= control target key end

     0   :  { %10 = vsyncpa [#allocation3], 0  ;;  %s3614_s0 = inlined_call_operand.hbm [shape: f32[16,32], index: 0, kind: input, shape index: {}]   ;;  %s3615_s1 = inlined_call_operand.hbm [shape: f32[5,32], index: 1, kind: input, shape index: {}]   ;;  %s3616_s2 = inlined_call_operand.hbm [shape: f32[32,128], index: 2, kind: input, shape index: {}]   ;;  %s3617_s3 = inlined_call_operand.vmem [shape: f32[1,96], index: 3, kind: input, shape index: {}]   ;;  %s3618_s4 = inlined_call_operand.hbm [shape: f32[16,16], index: 4, kind: input, shape index: {}]   ;;  %s3619_s5 = inlined_call_operand.hbm [shape: f32[16,32], index: 5, kind: output, shape index: {}]  }
   0x1   :  { %11 = vsyncpa [#allocation6], 0 }
   0x2   :  { %12 = vsyncpa [#allocation9], 0 }
   0x3   :  { %13 = vsyncpa [#allocation4], 0  ;;  %s3175_s18 = smov [#allocation5]   ;;  %s3176_s20 = smov [#allocation2]  }
   0x4   :  { %s32_s19 = sshll.u32 %s3175_s18, 4  ;;  %s19_s21 = sshll.u32 %s3176_s20, 4  ;;  %s33_s19 = int_to_ptr.vmem [resolvable:$true] %s32_s19  ;;  %s20_s21 = int_to_ptr.vmem [resolvable:$true] %s19_s21 }
   0x5   :  { %s3075_s22 = scalar_lea.vmem %s33_s19, 128  ;;  %p3080_p1 = scmp.lt.s32.totalorder %s33_s19, %s33_s19 }
   0x6   :  { %p3076_p0 = scmp.ne.s32.totalorder %s33_s19, %s3075_s22  ;;  %p3081_p2 = scmp.lt.s32.totalorder %s3075_s22, %s3075_s22 }
   0x8   :  { %p3082_p3 = por %p3081_p2, %p3080_p1 }
   0xa   :  { %p3083_p4 = pnand %p3082_p3, %p3076_p0 }
   0xc   :  { %3086 = shalt.err (!%p3083_p4)
}
   0xd   :  { %35 = dma.hbm_to_vmem [thread:$0]  %s3615_s1, 128, %s33_s19, [#allocation6]  }
   0xe   :  { %s3095_s25 = scalar_lea.vmem %s20_s21, 256  ;;  %p3100_p6 = scmp.lt.s32.totalorder %s20_s21, %s20_s21 }
   0xf   :  { %p3096_p5 = scmp.ne.s32.totalorder %s20_s21, %s3095_s25  ;;  %p3101_p7 = scmp.lt.s32.totalorder %s3095_s25, %s3095_s25 }
  0x11   :  { %p3102_p8 = por %p3101_p7, %p3100_p6 }
  0x13   :  { %p3103_p9 = pnand %p3102_p8, %p3096_p5 }
  0x15   :  { %3106 = shalt.err (!%p3103_p9)
}
  0x16   :  { %s3177_s26 = smov 128   ;;  %s3178_s27 = smov 8  }
  0x17   :  { %25 = dma.hbm_to_vmem [thread:$0]  %s3614_s0, 256, %s20_s21, [#allocation3], %s3177_s26, %s3177_s26, %s3178_s27  }
  0x18   :  { %s3179_s30 = smov [#allocation7]   ;;  %s3180_s7 = smov [#allocation8]  }
  0x19   :  { %s41_s6 = sshll.u32 %s3179_s30, 4  ;;  %s55_s1 = sshll.u32 %s3180_s7, 4  ;;  %s42_s6 = int_to_ptr.vmem [resolvable:$true] %s41_s6  ;;  %s56_s1 = int_to_ptr.vmem [resolvable:$true] %s55_s1 }
  0x1a   :  { %s3115_s8 = scalar_lea.vmem %s42_s6, 512  ;;  %p3120_p11 = scmp.lt.s32.totalorder %s42_s6, %s42_s6 }
  0x1b   :  { %p3116_p10 = scmp.ne.s32.totalorder %s42_s6, %s3115_s8  ;;  %p3121_p12 = scmp.lt.s32.totalorder %s3115_s8, %s3115_s8 }
  0x1d   :  { %p3122_p13 = por %p3121_p12, %p3120_p11 }
  0x1f   :  { %p3123_p0 = pnand %p3122_p13, %p3116_p10 }
  0x21   :  { %3126 = shalt.err (!%p3123_p0)
}
  0x22   :  { %47 = dma.hbm_to_vmem [thread:$0]  %s3616_s2, 512, %s42_s6, [#allocation6], %s3177_s26, %s3177_s26, %s3178_s27  }
  0x23   :  { %s3135_s0 = scalar_lea.vmem %s56_s1, 256  ;;  %p3140_p2 = scmp.lt.s32.totalorder %s56_s1, %s56_s1 }
  0x24   :  { %p3136_p1 = scmp.ne.s32.totalorder %s56_s1, %s3135_s0  ;;  %p3141_p3 = scmp.lt.s32.totalorder %s3135_s0, %s3135_s0 }
  0x26   :  { %p3142_p4 = por %p3141_p3, %p3140_p2 }
  0x28   :  { %p3143_p5 = pnand %p3142_p4, %p3136_p1 }
  0x2a   :  { %3146 = shalt.err (!%p3143_p5)
}
  0x2b   :  { %61 = dma.hbm_to_vmem [thread:$0]  %s3618_s4, 256, %s56_s1, [#allocation9], %s3177_s26, %s3177_s26, %s3178_s27  }
  0x2c   :  { %3167 = dma.done.wait [#allocation3], 256  }
  0x2d   :  { %3168 = vsyncadd [#allocation3], 4294967040 }
  0x2e   :  { %3169 = dma.done.wait [#allocation6], 640  }
  0x2f   :  { %3170 = vsyncadd [#allocation6], 4294966656 }
  0x30   :  { %3171 = dma.done.wait [#allocation9], 256  }
  0x31   :  { %3172 = vsyncadd [#allocation9], 4294967040  ;;  %vm84_vm0 = vcmask 261120   ;;  %v3245_v0 = vld [vmem:[#allocation2] sm:$0xff]  ;;  %v3247_v1 = vld [vmem:[#allocation2 + $0x8] sm:$0xff]  ;;  %v112_v23 = vlaneseq  ;;  %vm217_vm1 = vcmask 64512  }
  0x32   :  { %v85_v2 = vsel %vm84_vm0, %v3245_v0, 0.0  ;;  %v88_v3 = vsel %vm84_vm0, %v3247_v1, 0.0  ;;  %v3257_v14 = vld [vmem:[#allocation7 + $0x18] sm:$0xff]  ;;  %v3259_v15 = vld [vmem:[#allocation7 + $0x10] sm:$0xff]  ;;  %v3263_v16 = vld [vmem:[#allocation7 + $0x8] sm:$0xff]  ;;  %s3181_s13 = smov 96  }
  0x33   :  { %86 = vadd.xlane.f32.xlu0 %v85_v2  ;;  %2802 = vmatprep.subr.mxu0 %v3257_v14  ;;  %v3269_v17 = vld [vmem:[#allocation7] sm:$0xff]  ;;  %v3273_v25 = vshrl.u32 %v112_v23, 7  ;;  %v3276_v27 = vld [vmem:[#allocation5] sm:$0x1f]  ;;  %v3286_v39 = vld [vmem:[%s3617_s3] ss:$0 sm:$0xff] }
  0x34   :  { %2803 = vmatpush3.msra.mxu0 %v3257_v14  ;;  %s3182_s3 = smov 120   ;;  %s3183_s14 = smov 88   ;;  %v3320_v50 = vld [vmem:[#allocation8 + $0x8] sm:$0xff]  ;;  %v3322_v52 = vld [vmem:[#allocation8] sm:$0xff]  ;;  %vm301_vm2 = vcmask 130048  }
  0x35   :  { %2804 = vmatprep.subr.mxu0 %v3259_v15  ;;  %v114_v26 = vsub.s32 0, %v3273_v25  ;;  %v120_v28 = vsub.s32 1, %v3273_v25  ;;  %s3184_s15 = smov 64   ;;  %s3185_s16 = smov 56  }
  0x36   :  { %2805 = vmatpush3.msra.mxu0 %v3259_v15  ;;  %s3186_s17 = smov 32   ;;  %s3187_s18 = smov 80  }
  0x37   :  { %89 = vadd.xlane.f32.xlu0 %v88_v3  ;;  %2806 = vmatprep.subr.mxu0 %v3263_v16  ;;  %v115_v29 = vrot.slane %v3276_v27, %v114_v26  ;;  %v121_v32 = vrot.slane %v3276_v27, %v120_v28  ;;  %s3188_s19 = smov 112   ;;  %s3189_s20 = smov 72  }
  0x38   :  { %2807 = vmatpush3.msra.mxu0 %v3263_v16  ;;  %s3190_s21 = smov 104   ;;  %s3191_s22 = smov 48  }
  0x39   :  { %2808 = vmatprep.subr.mxu0 %v3269_v17  ;;  %s3192_s23 = smov 40   ;;  %s3193_s24 = smov [#allocation10]  }
  0x3a   :  { %2809 = vmatpush3.msra.mxu0 %v3269_v17  ;;  %s2619_s25 = sshll.u32 %s3193_s24, 4  ;;  %s2620_s25 = int_to_ptr.vmem [resolvable:$true] %s2619_s25 }
  0x3b   :  { %s3147_s28 = scalar_lea.vmem %s2620_s25, 256  ;;  %p3152_p7 = scmp.lt.s32.totalorder %s2620_s25, %s2620_s25 }
  0x3c   :  { %p3148_p6 = scmp.ne.s32.totalorder %s2620_s25, %s3147_s28  ;;  %p3153_p8 = scmp.lt.s32.totalorder %s3147_s28, %s3147_s28 }
  0x3e   :  { %p3154_p9 = por %p3153_p8, %p3152_p7 }
  0x40   :  { %p3155_p10 = pnand %p3154_p9, %p3148_p6 }
  0xbc   :  { %v87_v4 = vpop.xlane.xlu0 %86 }
  0xbd   :  { %v92_v5 = vmul.f32 0.03125, %v87_v4 }
  0xbf   :  { %v94_v6 = vsub.f32 %v3245_v0, %v92_v5 }
  0xc0   :  { %v90_v7 = vpop.xlane.xlu0 %89 }
  0xc1   :  { %v93_v8 = vmul.f32 0.03125, %v90_v7  ;;  %v96_v9 = vmul.f32 %v94_v6, %v94_v6 }
  0xc3   :  { %v95_v10 = vsub.f32 %v3247_v1, %v93_v8  ;;  %v98_v11 = vsel %vm84_vm0, %v96_v9, 0.0 }
  0xc4   :  { %99 = vadd.xlane.f32.xlu1 %v98_v11 }
  0xc5   :  { %v97_v12 = vmul.f32 %v95_v10, %v95_v10 }
  0xc7   :  { %v101_v13 = vsel %vm84_vm0, %v97_v12, 0.0 }
  0xc8   :  { %102 = vadd.xlane.f32.xlu1 %v101_v13 }
 0x14d   :  { %v100_v18 = vpop.xlane.xlu1 %99 }
 0x14e   :  { %v104_v19 = vmul.f32 0.03125, %v100_v18 }
 0x150   :  { %v106_v20 = vadd.f32 1e-05, %v104_v19 }
 0x151   :  { %v103_v21 = vpop.xlane.xlu1 %102 }
 0x152   :  { %2995 = vrsqrt.f32 %v106_v20  ;;  %v105_v22 = vmul.f32 0.03125, %v103_v21 }
 0x154   :  { %v107_v24 = vadd.f32 1e-05, %v105_v22 }
 0x156   :  { %2997 = vrsqrt.f32 %v107_v24 }
 0x15f   :  { %v2996_v30 = vpop.eup %2995 }
 0x160   :  { %v110_v31 = vmul.f32 %v2996_v30, %v94_v6 }
 0x162   :  { %v116_v33 = vmul.f32 %v115_v29, %v110_v31 }
 0x163   :  { %v2998_v34 = vpop.eup %2997 }
 0x164   :  { %v111_v35 = vmul.f32 %v2998_v34, %v95_v10  ;;  %v122_v36 = vadd.f32 %v121_v32, %v116_v33 }
 0x166   :  { %v117_v37 = vmul.f32 %v115_v29, %v111_v35  ;;  %2810 = vmatprep.mubr.msk.f32.mxu0 %vm84_vm0, %v122_v36 }
 0x168   :  { %v123_v38 = vadd.f32 %v121_v32, %v117_v37 }
 0x16a   :  { %2811 = vmatmul.mubr.msk.f32.vlgmr.msra.gmra.mxu0 %vm84_vm0, %v123_v38 }
 0x22a   :  { %v2812_v40 = vpop.f32.mrf.mxu0 }
 0x22b   :  { %v3289_v41 = vadd.f32 %v2812_v40, %v3286_v39 }
 0x22c   :  { %v202_v42 = vpop.f32.mrf.mxu0 }
 0x22d   :  { %v3292_v43 = vadd.f32 %v3286_v39, %v202_v42  ;;  %215 = vrot.lane.b32.xlu0 %v3289_v41, %s3181_s13 }
 0x22f   :  { %213 = vrot.lane.b32.xlu1 %v3292_v43, %s3181_s13  ;;  %2817 = vmatprep.mubr.msk.f32.mxu1 %vm217_vm1, %v3292_v43 }
 0x231   :  { %411 = vrot.lane.b32.xlu0 %v3292_v43, %s3182_s3 }
 0x233   :  { %417 = vrot.lane.b32.xlu1 %v3289_v41, %s3183_s14 }
 0x237   :  { %415 = vrot.lane.b32.xlu1 %v3292_v43, %s3183_s14 }
 0x23b   :  { %413 = vrot.lane.b32.xlu1 %v3289_v41, %s3182_s3 }
 0x29f   :  { %v216_v44 = vpop.permute.xlu0 %215 }
 0x2a0   :  { %2813 = vmatprep.subr.msk.mxu1 %vm217_vm1, %v216_v44 }
 0x2a1   :  { %2814 = vmatpush3.xpose.msk.msra.mxu1 %vm217_vm1, %v216_v44  ;;  %v214_v45 = vpop.permute.xlu1 %213 }
 0x2a2   :  { %2815 = vmatprep.subr.msk.mxu1 %vm217_vm1, %v214_v45 }
 0x2a3   :  { %v412_v47 = vpop.permute.xlu0 %411 }
 0x2a5   :  { %2816 = vmatpush3.xpose.msk.msra.mxu1 %vm217_vm1, %v214_v45  ;;  %v418_v46 = vpop.permute.xlu1 %417 }
 0x2a6   :  { %2827 = vmatprep.subr.msk.mxu1 %vm217_vm1, %v418_v46 }
 0x2a8   :  { %2818 = vmatmul.mubr.msk.f32.vlgmr.msra.gmra.mxu1 %vm217_vm1, %v3289_v41 }
 0x2a9   :  { %v416_v48 = vpop.permute.xlu1 %415  ;;  %2828 = vmatpush3.xpose.msk.msra.mxu1 %vm217_vm1, %v418_v46  ;;  %2831 = vmatprep.mubr.msk.f32.mxu1 %vm217_vm1, %v412_v47 }
 0x2aa   :  { %2829 = vmatprep.subr.msk.mxu1 %vm217_vm1, %v416_v48 }
 0x2ad   :  { %2830 = vmatpush3.xpose.msk.msra.mxu1 %vm217_vm1, %v416_v48  ;;  %v414_v49 = vpop.permute.xlu1 %413 }
 0x2b0   :  { %2832 = vmatmul.mubr.msk.f32.vlgmr.msra.gmra.mxu1 %vm217_vm1, %v414_v49 }
 0x368   :  { %v2819_v51 = vpop.f32.mrf.mxu1 }
 0x369   :  { %v298_v53 = vadd.f32 %v2819_v51, %v3320_v50 }
 0x36a   :  { %v292_v54 = vpop.f32.mrf.mxu1 }
 0x36b   :  { %v293_v55 = vadd.f32 %v292_v54, %v3322_v52  ;;  %v305_v56 = vsel %vm301_vm2, %v298_v53, -inf }
 0x36c   :  { %306 = vmax.xlane.f32.xlu1 %v305_v56 }
 0x36d   :  { %v302_v57 = vsel %vm301_vm2, %v293_v55, -inf }
 0x36e   :  { %303 = vmax.xlane.f32.xlu0 %v302_v57 }
 0x370   :  { %v2833_v58 = vpop.f32.mrf.mxu1 }
 0x371   :  { %v499_v61 = vadd.f32 %v2833_v58, %v3320_v50 }
 0x372   :  { %v493_v59 = vpop.f32.mrf.mxu1 }
 0x373   :  { %v494_v60 = vadd.f32 %v493_v59, %v3322_v52  ;;  %v505_v63 = vsel %vm301_vm2, %v499_v61, -inf }
 0x375   :  { %v502_v62 = vsel %vm301_vm2, %v494_v60, -inf }
 0x376   :  { %503 = vmax.xlane.f32.xlu0 %v502_v62 }
 0x37a   :  { %506 = vmax.xlane.f32.xlu0 %v505_v63 }
 0x3f5   :  { %v307_v2 = vpop.xlane.xlu1 %306 }
 0x3f6   :  { %v309_v3 = vsub.f32 %v298_v53, %v307_v2 }
 0x3f7   :  { %v304_v4 = vpop.xlane.xlu0 %303 }
 0x3f8   :  { %v312_v5 = vmul.f32 1.442695, %v309_v3  ;;  %v308_v6 = vsub.f32 %v293_v55, %v304_v4 }
 0x3fa   :  { %2999 = vpow2.f32 %v312_v5  ;;  %v310_v7 = vmul.f32 1.442695, %v308_v6 }
 0x3fc   :  { %3001 = vpow2.f32 %v310_v7 }
 0x3ff   :  { %v504_v8 = vpop.xlane.xlu0 %503 }
 0x400   :  { %v508_v9 = vsub.f32 %v494_v60, %v504_v8 }
 0x402   :  { %v510_v10 = vmul.f32 1.442695, %v508_v9 }
 0x403   :  { %v507_v11 = vpop.xlane.xlu0 %506 }
 0x404   :  { %3003 = vpow2.f32 %v510_v10  ;;  %v509_v12 = vsub.f32 %v499_v61, %v507_v11 }
 0x406   :  { %v512_v13 = vmul.f32 1.442695, %v509_v12 }
 0x407   :  { %v3000_v18 = vpop.eup %2999 }
 0x408   :  { %3005 = vpow2.f32 %v512_v13  ;;  %v317_v19 = vsel %vm301_vm2, %v3000_v18, 0.0 }
 0x409   :  { %v3002_v20 = vpop.eup %3001  ;;  %318 = vadd.xlane.f32.xlu1 %v317_v19 }
 0x40a   :  { %v314_v21 = vsel %vm301_vm2, %v3002_v20, 0.0 }
 0x40b   :  { %315 = vadd.xlane.f32.xlu0 %v314_v21 }
 0x411   :  { %v3004_v22 = vpop.eup %3003 }
 0x412   :  { %v514_v23 = vsel %vm301_vm2, %v3004_v22, 0.0 }
 0x413   :  { %515 = vadd.xlane.f32.xlu0 %v514_v23 }
 0x415   :  { %v3006_v24 = vpop.eup %3005 }
 0x416   :  { %v517_v26 = vsel %vm301_vm2, %v3006_v24, 0.0 }
 0x417   :  { %518 = vadd.xlane.f32.xlu1 %v517_v26 }
 0x428   :  { %324 = vrot.lane.b32.xlu1 %v3292_v43, %s3184_s15 }
 0x429   :  { %326 = vrot.lane.b32.xlu0 %v3289_v41, %s3184_s15 }
 0x42c   :  { %526 = vrot.lane.b32.xlu1 %v3289_v41, %s3185_s16 }
 0x42d   :  { %612 = vrot.lane.b32.xlu0 %v3263_v16, %s3186_s17 }
 0x430   :  { %524 = vrot.lane.b32.xlu1 %v3292_v43, %s3185_s16 }
 0x431   :  { %785 = vrot.lane.b32.xlu0 %v3292_v43, %s3187_s18 }
 0x434   :  { %787 = vrot.lane.b32.xlu1 %v3289_v41, %s3187_s18 }
 0x435   :  { %783 = vrot.lane.b32.xlu0 %v3289_v41, %s3188_s19 }
 0x438   :  { %781 = vrot.lane.b32.xlu1 %v3292_v43, %s3188_s19 }
 0x439   :  { %1072 = vrot.lane.b32.xlu0 %v3292_v43, %s3189_s20 }
 0x43c   :  { %1074 = vrot.lane.b32.xlu1 %v3289_v41, %s3189_s20 }
 0x43d   :  { %1070 = vrot.lane.b32.xlu0 %v3289_v41, %s3190_s21 }
 0x440   :  { %1068 = vrot.lane.b32.xlu1 %v3292_v43, %s3190_s21 }
 0x492   :  { %v319_v28 = vpop.xlane.xlu1 %318 }
 0x493   :  { %3007 = vrcp.f32 %v319_v28 }
 0x494   :  { %v316_v29 = vpop.xlane.xlu0 %315 }
 0x495   :  { %3009 = vrcp.f32 %v316_v29 }
 0x49c   :  { %v516_v30 = vpop.xlane.xlu0 %515 }
 0x49d   :  { %3011 = vrcp.f32 %v516_v30 }
 0x4a0   :  { %v519_v31 = vpop.xlane.xlu1 %518  ;;  %v327_v32 = vpop.permute.xlu0 %326 }
 0x4a1   :  { %v3008_v33 = vpop.eup %3007  ;;  %3013 = vrcp.f32 %v519_v31  ;;  %2820 = vmatprep.subr.mxu0 %v327_v32 }
 0x4a2   :  { %v3010_v34 = vpop.eup %3009  ;;  %2821 = vmatpush3.msra.mxu0 %v327_v32  ;;  %v323_v37 = vmul.f32 %v3008_v33, %v3000_v18 }
 0x4a3   :  { %v322_v35 = vmul.f32 %v3010_v34, %v3002_v20 }
 0x4a4   :  { %v325_v36 = vpop.permute.xlu1 %324  ;;  %v3365_v46 = vpop.permute.xlu0 %612 }
 0x4a5   :  { %2822 = vmatprep.subr.mxu0 %v325_v36  ;;  %2824 = vmatprep.mubr.msk.f32.mxu0 %vm301_vm2, %v322_v35 }
 0x4a6   :  { %2823 = vmatpush3.msra.mxu0 %v325_v36 }
 0x4a7   :  { %2825 = vmatmul.mubr.msk.f32.vlgmr.msra.gmra.mxu0 %vm301_vm2, %v323_v37 }
 0x4a8   :  { %v527_v38 = vpop.permute.xlu1 %526  ;;  %v786_v55 = vpop.permute.xlu0 %785 }
 0x4a9   :  { %2834 = vmatprep.subr.mxu0 %v527_v38 }
 0x4aa   :  { %v3012_v40 = vpop.eup %3011  ;;  %2835 = vmatpush3.msra.mxu0 %v527_v38 }
 0x4ab   :  { %v522_v42 = vmul.f32 %v3012_v40, %v3004_v22 }
 0x4ac   :  { %v525_v44 = vpop.permute.xlu1 %524  ;;  %v784_v58 = vpop.permute.xlu0 %783 }
 0x4ad   :  { %2836 = vmatprep.subr.mxu0 %v525_v44  ;;  %2838 = vmatprep.mubr.msk.f32.mxu0 %vm301_vm2, %v522_v42 }
 0x4ae   :  { %v3014_v45 = vpop.eup %3013  ;;  %2837 = vmatpush3.msra.mxu0 %v525_v44 }
 0x4af   :  { %2841 = vmatprep.subr.mxu0 %v3365_v46  ;;  %v523_v47 = vmul.f32 %v3014_v45, %v3006_v24 }
 0x4b0   :  { %v788_v48 = vpop.permute.xlu1 %787  ;;  %v1073_v60 = vpop.permute.xlu0 %1072 }
 0x4b1   :  { %2839 = vmatmul.mubr.msk.f32.vlgmr.msra.gmra.mxu0 %vm301_vm2, %v523_v47 }
 0x4b2   :  { %2842 = vmatpush3.msra.mxu0 %v3365_v46 }
 0x4b3   :  { %2851 = vmatprep.subr.msk.mxu0 %vm217_vm1, %v788_v48 }
 0x4b4   :  { %v782_v53 = vpop.permute.xlu1 %781  ;;  %v1071_v61 = vpop.permute.xlu0 %1070 }
 0x4b8   :  { %v1075_v57 = vpop.permute.xlu1 %1074 }
 0x4bc   :  { %v1069_v59 = vpop.permute.xlu1 %1068 }
 0x567   :  { %v2826_v49 = vpop.f32.mrf.mxu0 }
 0x569   :  { %v402_v51 = vpop.f32.mrf.mxu0 }
 0x56a   :  { %2848 = vmatprep.mubr.msk.f32.mxu1 %vm217_vm1, %v402_v51 }
 0x571   :  { %v2840_v54 = vpop.f32.mrf.mxu0 }
 0x573   :  { %v602_v56 = vpop.f32.mrf.mxu0 }
 0x574   :  { %2843 = vmatprep.mubr.msk.f32.mxu0 %vm217_vm1, %v602_v56 }
 0x575   :  { %2844 = vmatmul.mubr.msk.f32.vlgmr.msra.gmra.mxu0 %vm217_vm1, %v2840_v54 }
 0x576   :  { %2852 = vmatpush3.xpose.msk.msra.mxu0 %vm217_vm1, %v788_v48  ;;  %2855 = vmatprep.mubr.msk.f32.mxu0 %vm217_vm1, %v782_v53 }
 0x577   :  { %2853 = vmatprep.subr.msk.mxu0 %vm217_vm1, %v786_v55 }
 0x57a   :  { %2854 = vmatpush3.xpose.msk.msra.mxu0 %vm217_vm1, %v786_v55 }
 0x57b   :  { %2870 = vmatprep.subr.msk.mxu0 %vm217_vm1, %v1075_v57 }
 0x57d   :  { %2856 = vmatmul.mubr.msk.f32.vlgmr.msra.gmra.mxu0 %vm217_vm1, %v784_v58 }
 0x57e   :  { %2871 = vmatpush3.xpose.msk.msra.mxu0 %vm217_vm1, %v1075_v57  ;;  %2874 = vmatprep.mubr.msk.f32.mxu0 %vm217_vm1, %v1069_v59 }
 0x57f   :  { %2872 = vmatprep.subr.msk.mxu0 %vm217_vm1, %v1073_v60 }
 0x582   :  { %2873 = vmatpush3.xpose.msk.msra.mxu0 %vm217_vm1, %v1073_v60 }
 0x583   :  { %2889 = vmatprep.subr.mxu0 %v3257_v14 }
 0x585   :  { %2875 = vmatmul.mubr.msk.f32.vlgmr.msra.gmra.mxu0 %vm217_vm1, %v1071_v61 }
 0x586   :  { %2890 = vmatpush3.msra.mxu0 %v3257_v14 }
 0x587   :  { %2891 = vmatprep.subr.mxu0 %v3259_v15 }
 0x588   :  { %2892 = vmatpush3.msra.mxu0 %v3259_v15 }
 0x589   :  { %2893 = vmatprep.subr.mxu0 %v3263_v16 }
 0x58a   :  { %2894 = vmatpush3.msra.mxu0 %v3263_v16 }
 0x58b   :  { %2895 = vmatprep.subr.mxu0 %v3269_v17 }
 0x58c   :  { %2896 = vmatpush3.msra.mxu0 %v3269_v17 }
 0x635   :  { %v3393_v62 = vpop.f32.mrf.mxu0 }
 0x637   :  { %v3395_v63 = vpop.f32.mrf.mxu0 }
 0x63d   :  { %v2857_v2 = vpop.f32.mrf.mxu0 }
 0x63e   :  { %v869_v3 = vadd.f32 %v2857_v2, %v3320_v50 }
 0x63f   :  { %v863_v4 = vpop.f32.mrf.mxu0 }
 0x640   :  { %v864_v5 = vadd.f32 %v863_v4, %v3322_v52  ;;  %v875_v6 = vsel %vm301_vm2, %v869_v3, -inf }
 0x641   :  { %876 = vmax.xlane.f32.xlu0 %v875_v6 }
 0x642   :  { %v872_v7 = vsel %vm301_vm2, %v864_v5, -inf }
 0x643   :  { %873 = vmax.xlane.f32.xlu1 %v872_v7 }
 0x645   :  { %v2876_v16 = vpop.f32.mrf.mxu0 }
 0x646   :  { %v1156_v31 = vadd.f32 %v2876_v16, %v3320_v50 }
 0x647   :  { %v1150_v8 = vpop.f32.mrf.mxu0 }
 0x648   :  { %v1151_v9 = vadd.f32 %v1150_v8, %v3322_v52  ;;  %v1162_v32 = vsel %vm301_vm2, %v1156_v31, -inf  ;;  %v1357_v8 = vsub.s32 4, %v3273_v25 }
 0x64a   :  { %v1159_v10 = vsel %vm301_vm2, %v1151_v9, -inf }
 0x654   :  { %697 = vrot.lane.b32.xlu1 %v3269_v17, %s3186_s17 }
 0x658   :  { %894 = vrot.lane.b32.xlu1 %v3292_v43, %s3191_s22 }
 0x67c   :  { %1160 = vmax.xlane.f32.xlu1 %v1159_v10  ;;  %v3448_v10 = vrot.slane %v3276_v27, %v1357_v8 }
 0x6ca   :  { %v877_v11 = vpop.xlane.xlu0 %876 }
 0x6cb   :  { %v879_v12 = vsub.f32 %v869_v3, %v877_v11 }
 0x6cc   :  { %v874_v13 = vpop.xlane.xlu1 %873 }
 0x6cd   :  { %v882_v18 = vmul.f32 1.442695, %v879_v12  ;;  %v878_v19 = vsub.f32 %v864_v5, %v874_v13 }
 0x6cf   :  { %3015 = vpow2.f32 %v882_v18  ;;  %v880_v20 = vmul.f32 1.442695, %v878_v19 }
 0x6d0   :  { %v3407_v21 = vpop.permute.xlu1 %697 }
 0x6d1   :  { %3017 = vpow2.f32 %v880_v20  ;;  %2846 = vmatprep.subr.mxu1 %v3407_v21 }
 0x6d2   :  { %2847 = vmatpush3.msra.mxu1 %v3407_v21 }
 0x6d3   :  { %2849 = vmatmul.mubr.msk.f32.vlgmr.msra.gmra.mxu1 %vm217_vm1, %v2826_v49 }
 0x6d4   :  { %v895_v26 = vpop.permute.xlu1 %894 }
 0x6dc   :  { %v3016_v17 = vpop.eup %3015 }
 0x6dd   :  { %v887_v22 = vsel %vm301_vm2, %v3016_v17, 0.0 }
 0x6de   :  { %v3018_v23 = vpop.eup %3017  ;;  %888 = vadd.xlane.f32.xlu0 %v887_v22 }
 0x6df   :  { %v884_v24 = vsel %vm301_vm2, %v3018_v23, 0.0 }
 0x6e2   :  { %885 = vadd.xlane.f32.xlu0 %v884_v24 }
 0x6f8   :  { %896 = vrot.lane.b32.xlu0 %v3289_v41, %s3191_s22 }
 0x705   :  { %v1161_v28 = vpop.xlane.xlu1 %1160 }
 0x706   :  { %v1165_v29 = vsub.f32 %v1151_v9, %v1161_v28 }
 0x708   :  { %v1167_v30 = vmul.f32 1.442695, %v1165_v29 }
 0x70a   :  { %3019 = vpow2.f32 %v1167_v30 }
 0x717   :  { %v3020_v33 = vpop.eup %3019  ;;  %1163 = vmax.xlane.f32.xlu0 %v1162_v32 }
 0x718   :  { %v1171_v34 = vsel %vm301_vm2, %v3020_v33, 0.0 }
 0x71b   :  { %1172 = vadd.xlane.f32.xlu0 %v1171_v34 }
 0x731   :  { %982 = vrot.lane.b32.xlu0 %v3259_v15, %s3186_s17 }
 0x767   :  { %v889_v35 = vpop.xlane.xlu0 %888 }
 0x768   :  { %3021 = vrcp.f32 %v889_v35 }
 0x76b   :  { %v886_v36 = vpop.xlane.xlu0 %885 }
 0x76c   :  { %3023 = vrcp.f32 %v886_v36 }
 0x76f   :  { %v897_v37 = vpop.permute.xlu0 %896 }
 0x770   :  { %2858 = vmatprep.subr.mxu1 %v897_v37 }
 0x771   :  { %2859 = vmatpush3.msra.mxu1 %v897_v37 }
 0x772   :  { %2860 = vmatprep.subr.mxu1 %v895_v26 }
 0x773   :  { %2861 = vmatpush3.msra.mxu1 %v895_v26 }
 0x775   :  { %v3022_v38 = vpop.eup %3021 }
 0x776   :  { %v893_v44 = vmul.f32 %v3022_v38, %v3016_v17 }
 0x779   :  { %v3024_v40 = vpop.eup %3023 }
 0x77a   :  { %v892_v42 = vmul.f32 %v3024_v40, %v3018_v23 }
 0x77c   :  { %2862 = vmatprep.mubr.msk.f32.mxu1 %vm301_vm2, %v892_v42  ;;  %v1391_v42 = vsub.s32 2, %v3273_v25 }
 0x77d   :  { %2863 = vmatmul.mubr.msk.f32.vlgmr.msra.gmra.mxu1 %vm301_vm2, %v893_v44  ;;  %v1397_v44 = vsub.s32 3, %v3273_v25 }
 0x793   :  { %v2850_v54 = vpop.f32.mrf.mxu1 }
 0x794   :  { %v778_v3 = vadd.f32 %v2850_v54, %v3393_v62 }
 0x795   :  { %v772_v55 = vpop.f32.mrf.mxu1 }
 0x796   :  { %v773_v9 = vadd.f32 %v772_v55, %v3395_v63 }
 0x7a0   :  { %v1164_v45 = vpop.xlane.xlu0 %1163 }
 0x7a1   :  { %v1166_v47 = vsub.f32 %v1156_v31, %v1164_v45  ;;  %v1392_v45 = vrot.slane %v3276_v27, %v1391_v42 }
 0x7a3   :  { %v1169_v15 = vmul.f32 1.442695, %v1166_v47 }
 0x7a4   :  { %v1173_v51 = vpop.xlane.xlu0 %1172 }
 0x7a5   :  { %3025 = vpow2.f32 %v1169_v15 }
 0x7a6   :  { %3027 = vrcp.f32 %v1173_v51 }
 0x7a8   :  { %v3424_v53 = vpop.permute.xlu0 %982 }
 0x7a9   :  { %2865 = vmatprep.subr.mxu1 %v3424_v53 }
 0x7aa   :  { %2866 = vmatpush3.msra.mxu1 %v3424_v53 }
 0x7b2   :  { %v3026_v48 = vpop.eup %3025 }
 0x7b3   :  { %v1174_v49 = vsel %vm301_vm2, %v3026_v48, 0.0  ;;  %v3028_v56 = vpop.eup %3027 }
 0x7b4   :  { %1175 = vadd.xlane.f32.xlu1 %v1174_v49  ;;  %v1179_v60 = vmul.f32 %v3028_v56, %v3020_v33 }
 0x7c5   :  { %1183 = vrot.lane.b32.xlu1 %v3289_v41, %s3192_s23 }
 0x7c9   :  { %1181 = vrot.lane.b32.xlu1 %v3292_v43, %s3192_s23 }
 0x7cd   :  { %1269 = vrot.lane.b32.xlu1 %v3257_v14, %s3186_s17 }
 0x83d   :  { %v2864_v57 = vpop.f32.mrf.mxu1  ;;  %v1176_v58 = vpop.xlane.xlu1 %1175 }
 0x83e   :  { %3029 = vrcp.f32 %v1176_v58 }
 0x83f   :  { %v972_v59 = vpop.f32.mrf.mxu1 }
 0x840   :  { %2867 = vmatprep.mubr.msk.f32.mxu1 %vm217_vm1, %v972_v59 }
 0x841   :  { %v1184_v61 = vpop.permute.xlu1 %1183  ;;  %2868 = vmatmul.mubr.msk.f32.vlgmr.msra.gmra.mxu1 %vm217_vm1, %v2864_v57 }
 0x842   :  { %2877 = vmatprep.subr.mxu1 %v1184_v61  ;;  %2881 = vmatprep.mubr.msk.f32.mxu1 %vm301_vm2, %v1179_v60 }
 0x843   :  { %2878 = vmatpush3.msra.mxu1 %v1184_v61 }
 0x845   :  { %v1182_v41 = vpop.permute.xlu1 %1181 }
 0x846   :  { %2879 = vmatprep.subr.mxu1 %v1182_v41 }
 0x847   :  { %2880 = vmatpush3.msra.mxu1 %v1182_v41 }
 0x849   :  { %v3438_v2 = vpop.permute.xlu1 %1269 }
 0x84a   :  { %2884 = vmatprep.subr.mxu1 %v3438_v2 }
 0x84b   :  { %v3030_v14 = vpop.eup %3029 }
 0x84c   :  { %v1180_v43 = vmul.f32 %v3030_v14, %v3026_v48  ;;  %v1398_v48 = vrot.slane %v3276_v27, %v1397_v44 }
 0x84e   :  { %2882 = vmatmul.mubr.msk.f32.vlgmr.msra.gmra.mxu1 %vm301_vm2, %v1180_v43 }
 0x84f   :  { %2885 = vmatpush3.msra.mxu1 %v3438_v2 }
 0x901   :  { %v2869_v4 = vpop.f32.mrf.mxu1 }
 0x902   :  { %v1067_v5 = vadd.f32 %v2869_v4, %v778_v3 }
 0x903   :  { %v1057_v6 = vpop.f32.mrf.mxu1 }
 0x904   :  { %v1066_v12 = vadd.f32 %v1057_v6, %v773_v9 }
 0x90e   :  { %v2883_v7 = vpop.f32.mrf.mxu1 }
 0x910   :  { %v1259_v16 = vpop.f32.mrf.mxu1 }
 0x911   :  { %2886 = vmatprep.mubr.msk.f32.mxu1 %vm217_vm1, %v1259_v16 }
 0x912   :  { %2887 = vmatmul.mubr.msk.f32.vlgmr.msra.gmra.mxu1 %vm217_vm1, %v2883_v7 }
 0x9d2   :  { %v2888_v11 = vpop.f32.mrf.mxu1 }
 0x9d3   :  { %v1354_v13 = vadd.f32 %v2888_v11, %v1067_v5 }
 0x9d4   :  { %v1344_v62 = vpop.f32.mrf.mxu1 }
 0x9d5   :  { %v1360_v18 = vadd.f32 %v3448_v10, %v1354_v13  ;;  %v1353_v19 = vadd.f32 %v1344_v62, %v1066_v12 }
 0x9d7   :  { %v3452_v20 = vadd.f32 %v1360_v18, %v3247_v1  ;;  %v1359_v17 = vadd.f32 %v3448_v10, %v1353_v19 }
 0x9d9   :  { %v3456_v22 = vadd.f32 %v1359_v17, %v3245_v0  ;;  %v1366_v63 = vsel %vm84_vm0, %v3452_v20, 0.0 }
 0x9da   :  { %1367 = vadd.xlane.f32.xlu1 %v1366_v63 }
 0x9db   :  { %v1363_v23 = vsel %vm84_vm0, %v3456_v22, 0.0 }
 0x9dc   :  { %1364 = vadd.xlane.f32.xlu0 %v1363_v23 }
 0xa63   :  { %v1368_v24 = vpop.xlane.xlu1 %1367 }
 0xa64   :  { %v1370_v26 = vmul.f32 0.03125, %v1368_v24 }
 0xa65   :  { %v1365_v28 = vpop.xlane.xlu0 %1364 }
 0xa66   :  { %v1369_v29 = vmul.f32 0.03125, %v1365_v28  ;;  %v1372_v1 = vsub.f32 %v3452_v20, %v1370_v26 }
 0xa68   :  { %v1371_v30 = vsub.f32 %v3456_v22, %v1369_v29  ;;  %v1374_v32 = vmul.f32 %v1372_v1, %v1372_v1 }
 0xa6a   :  { %v1373_v31 = vmul.f32 %v1371_v30, %v1371_v30  ;;  %v1378_v33 = vsel %vm84_vm0, %v1374_v32, 0.0 }
 0xa6c   :  { %v1375_v0 = vsel %vm84_vm0, %v1373_v31, 0.0 }
 0xa6d   :  { %1376 = vadd.xlane.f32.xlu0 %v1375_v0 }
 0xa71   :  { %1379 = vadd.xlane.f32.xlu0 %v1378_v33 }
 0xaf6   :  { %v1377_v34 = vpop.xlane.xlu0 %1376 }
 0xaf7   :  { %v1381_v35 = vmul.f32 0.03125, %v1377_v34 }
 0xaf9   :  { %v1383_v36 = vadd.f32 1e-05, %v1381_v35 }
 0xafa   :  { %v1380_v37 = vpop.xlane.xlu0 %1379 }
 0xafb   :  { %3031 = vrsqrt.f32 %v1383_v36  ;;  %v1382_v38 = vmul.f32 0.03125, %v1380_v37 }
 0xafd   :  { %v1384_v40 = vadd.f32 1e-05, %v1382_v38 }
 0xaff   :  { %3033 = vrsqrt.f32 %v1384_v40 }
 0xb08   :  { %v3032_v47 = vpop.eup %3031 }
 0xb09   :  { %v1387_v15 = vmul.f32 %v3032_v47, %v1371_v30 }
 0xb0b   :  { %v1393_v49 = vmul.f32 %v1392_v45, %v1387_v15 }
 0xb0c   :  { %v3034_v51 = vpop.eup %3033 }
 0xb0d   :  { %v1388_v54 = vmul.f32 %v3034_v51, %v1372_v1  ;;  %v1399_v55 = vadd.f32 %v1398_v48, %v1393_v49 }
 0xb0f   :  { %v1394_v56 = vmul.f32 %v1392_v45, %v1388_v54  ;;  %2897 = vmatprep.mubr.msk.f32.mxu0 %vm84_vm0, %v1399_v55 }
 0xb11   :  { %v1400_v57 = vadd.f32 %v1398_v48, %v1394_v56 }
 0xb13   :  { %2898 = vmatmul.mubr.msk.f32.vlgmr.msra.gmra.mxu0 %vm84_vm0, %v1400_v57 }
 0xbd3   :  { %v2899_v58 = vpop.f32.mrf.mxu0 }
 0xbd4   :  { %v3473_v59 = vadd.f32 %v2899_v58, %v3286_v39 }
 0xbd5   :  { %v1473_v25 = vpop.f32.mrf.mxu0 }
 0xbd6   :  { %v3476_v60 = vadd.f32 %v3286_v39, %v1473_v25  ;;  %1486 = vrot.lane.b32.xlu0 %v3473_v59, %s3181_s13 }
 0xbd8   :  { %1484 = vrot.lane.b32.xlu1 %v3476_v60, %s3181_s13  ;;  %2904 = vmatprep.mubr.msk.f32.mxu1 %vm217_vm1, %v3476_v60 }
 0xbda   :  { %1680 = vrot.lane.b32.xlu0 %v3476_v60, %s3182_s3 }
 0xbdc   :  { %1686 = vrot.lane.b32.xlu1 %v3473_v59, %s3183_s14 }
 0xbe0   :  { %1684 = vrot.lane.b32.xlu1 %v3476_v60, %s3183_s14 }
 0xbe4   :  { %1682 = vrot.lane.b32.xlu1 %v3473_v59, %s3182_s3 }
 0xc48   :  { %v1487_v27 = vpop.permute.xlu0 %1486 }
 0xc49   :  { %2900 = vmatprep.subr.msk.mxu1 %vm217_vm1, %v1487_v27 }
 0xc4a   :  { %2901 = vmatpush3.xpose.msk.msra.mxu1 %vm217_vm1, %v1487_v27  ;;  %v1485_v39 = vpop.permute.xlu1 %1484 }
 0xc4b   :  { %2902 = vmatprep.subr.msk.mxu1 %vm217_vm1, %v1485_v39 }
 0xc4c   :  { %v1681_v41 = vpop.permute.xlu0 %1680 }
 0xc4e   :  { %2903 = vmatpush3.xpose.msk.msra.mxu1 %vm217_vm1, %v1485_v39  ;;  %v1687_v61 = vpop.permute.xlu1 %1686 }
 0xc4f   :  { %2914 = vmatprep.subr.msk.mxu1 %vm217_vm1, %v1687_v61 }
 0xc51   :  { %2905 = vmatmul.mubr.msk.f32.vlgmr.msra.gmra.mxu1 %vm217_vm1, %v3473_v59 }
 0xc52   :  { %v1685_v14 = vpop.permute.xlu1 %1684  ;;  %2915 = vmatpush3.xpose.msk.msra.mxu1 %vm217_vm1, %v1687_v61  ;;  %2918 = vmatprep.mubr.msk.f32.mxu1 %vm217_vm1, %v1681_v41 }
 0xc53   :  { %2916 = vmatprep.subr.msk.mxu1 %vm217_vm1, %v1685_v14 }
 0xc56   :  { %2917 = vmatpush3.xpose.msk.msra.mxu1 %vm217_vm1, %v1685_v14  ;;  %v1683_v43 = vpop.permute.xlu1 %1682 }
 0xc57   :  { %2933 = vmatprep.subr.mxu1 %v3407_v21 }
 0xc59   :  { %2919 = vmatmul.mubr.msk.f32.vlgmr.msra.gmra.mxu1 %vm217_vm1, %v1683_v43 }
 0xc5a   :  { %2934 = vmatpush3.msra.mxu1 %v3407_v21 }
 0xd11   :  { %v2906_v3 = vpop.f32.mrf.mxu1 }
 0xd12   :  { %v1568_v4 = vadd.f32 %v2906_v3, %v3320_v50 }
 0xd13   :  { %v1562_v5 = vpop.f32.mrf.mxu1 }
 0xd14   :  { %v1563_v6 = vadd.f32 %v1562_v5, %v3322_v52  ;;  %v1574_v7 = vsel %vm301_vm2, %v1568_v4, -inf }
 0xd15   :  { %1575 = vmax.xlane.f32.xlu1 %v1574_v7 }
 0xd16   :  { %v1571_v16 = vsel %vm301_vm2, %v1563_v6, -inf }
 0xd17   :  { %1572 = vmax.xlane.f32.xlu0 %v1571_v16 }
 0xd19   :  { %v2920_v8 = vpop.f32.mrf.mxu1 }
 0xd1a   :  { %v1768_v12 = vadd.f32 %v2920_v8, %v3320_v50 }
 0xd1b   :  { %v1762_v9 = vpop.f32.mrf.mxu1 }
 0xd1c   :  { %v1763_v11 = vadd.f32 %v1762_v9, %v3322_v52  ;;  %v1774_v13 = vsel %vm301_vm2, %v1768_v12, -inf }
 0xd1e   :  { %v1771_v21 = vsel %vm301_vm2, %v1763_v11, -inf }
 0xd1f   :  { %1772 = vmax.xlane.f32.xlu0 %v1771_v21 }
 0xd23   :  { %1775 = vmax.xlane.f32.xlu0 %v1774_v13 }
 0xd9e   :  { %v1576_v62 = vpop.xlane.xlu1 %1575 }
 0xd9f   :  { %v1578_v18 = vsub.f32 %v1568_v4, %v1576_v62 }
 0xda0   :  { %v1573_v19 = vpop.xlane.xlu0 %1572 }
 0xda1   :  { %v1581_v17 = vmul.f32 1.442695, %v1578_v18  ;;  %v1577_v63 = vsub.f32 %v1563_v6, %v1573_v19 }
 0xda3   :  { %3035 = vpow2.f32 %v1581_v17  ;;  %v1579_v23 = vmul.f32 1.442695, %v1577_v63 }
 0xda5   :  { %3037 = vpow2.f32 %v1579_v23 }
 0xda8   :  { %v1773_v24 = vpop.xlane.xlu0 %1772 }
 0xda9   :  { %v1777_v26 = vsub.f32 %v1763_v11, %v1773_v24 }
 0xdab   :  { %v1779_v28 = vmul.f32 1.442695, %v1777_v26 }
 0xdac   :  { %v1776_v29 = vpop.xlane.xlu0 %1775 }
 0xdad   :  { %3039 = vpow2.f32 %v1779_v28  ;;  %v1778_v1 = vsub.f32 %v1768_v12, %v1776_v29 }
 0xdaf   :  { %v1781_v30 = vmul.f32 1.442695, %v1778_v1 }
 0xdb0   :  { %v3036_v31 = vpop.eup %3035 }
 0xdb1   :  { %3041 = vpow2.f32 %v1781_v30  ;;  %v1586_v0 = vsel %vm301_vm2, %v3036_v31, 0.0 }
 0xdb2   :  { %v3038_v32 = vpop.eup %3037  ;;  %1587 = vadd.xlane.f32.xlu1 %v1586_v0 }
 0xdb3   :  { %v1583_v33 = vsel %vm301_vm2, %v3038_v32, 0.0 }
 0xdb4   :  { %1584 = vadd.xlane.f32.xlu0 %v1583_v33 }
 0xdba   :  { %v3040_v34 = vpop.eup %3039 }
 0xdbb   :  { %v1783_v35 = vsel %vm301_vm2, %v3040_v34, 0.0 }
 0xdbc   :  { %1784 = vadd.xlane.f32.xlu0 %v1783_v35 }
 0xdbe   :  { %v3042_v36 = vpop.eup %3041 }
 0xdbf   :  { %v1786_v37 = vsel %vm301_vm2, %v3042_v36, 0.0 }
 0xdc0   :  { %1787 = vadd.xlane.f32.xlu1 %v1786_v37 }
 0xdd1   :  { %1593 = vrot.lane.b32.xlu1 %v3476_v60, %s3184_s15 }
 0xdd2   :  { %1595 = vrot.lane.b32.xlu0 %v3473_v59, %s3184_s15 }
 0xdd5   :  { %1795 = vrot.lane.b32.xlu1 %v3473_v59, %s3185_s16 }
 0xdd6   :  { %2048 = vrot.lane.b32.xlu0 %v3473_v59, %s3187_s18 }
 0xdd9   :  { %1793 = vrot.lane.b32.xlu1 %v3476_v60, %s3185_s16 }
 0xdda   :  { %2042 = vrot.lane.b32.xlu0 %v3476_v60, %s3188_s19 }
 0xddd   :  { %2046 = vrot.lane.b32.xlu1 %v3476_v60, %s3187_s18 }
 0xdde   :  { %2331 = vrot.lane.b32.xlu0 %v3473_v59, %s3189_s20 }
 0xde1   :  { %2044 = vrot.lane.b32.xlu1 %v3473_v59, %s3188_s19 }
 0xde2   :  { %2325 = vrot.lane.b32.xlu0 %v3476_v60, %s3190_s21 }
 0xde5   :  { %2329 = vrot.lane.b32.xlu1 %v3476_v60, %s3189_s20 }
 0xde9   :  { %2327 = vrot.lane.b32.xlu1 %v3473_v59, %s3190_s21 }
 0xe3b   :  { %v1588_v38 = vpop.xlane.xlu1 %1587 }
 0xe3c   :  { %3043 = vrcp.f32 %v1588_v38 }
 0xe3d   :  { %v1585_v40 = vpop.xlane.xlu0 %1584 }
 0xe3e   :  { %3045 = vrcp.f32 %v1585_v40 }
 0xe45   :  { %v1785_v42 = vpop.xlane.xlu0 %1784 }
 0xe46   :  { %3047 = vrcp.f32 %v1785_v42 }
 0xe49   :  { %v1788_v44 = vpop.xlane.xlu1 %1787  ;;  %v1596_v45 = vpop.permute.xlu0 %1595 }
 0xe4a   :  { %v3044_v47 = vpop.eup %3043  ;;  %3049 = vrcp.f32 %v1788_v44  ;;  %2907 = vmatprep.subr.mxu0 %v1596_v45 }
 0xe4b   :  { %v3046_v15 = vpop.eup %3045  ;;  %2908 = vmatpush3.msra.mxu0 %v1596_v45  ;;  %v1592_v51 = vmul.f32 %v3044_v47, %v3036_v31 }
 0xe4c   :  { %v1591_v48 = vmul.f32 %v3046_v15, %v3038_v32 }
 0xe4d   :  { %v1594_v49 = vpop.permute.xlu1 %1593  ;;  %v2049_v27 = vpop.permute.xlu0 %2048 }
 0xe4e   :  { %2909 = vmatprep.subr.mxu0 %v1594_v49  ;;  %2911 = vmatprep.mubr.msk.f32.mxu0 %vm301_vm2, %v1591_v48 }
 0xe4f   :  { %2910 = vmatpush3.msra.mxu0 %v1594_v49 }
 0xe50   :  { %2912 = vmatmul.mubr.msk.f32.vlgmr.msra.gmra.mxu0 %vm301_vm2, %v1592_v51 }
 0xe51   :  { %v1796_v54 = vpop.permute.xlu1 %1795  ;;  %v2043_v41 = vpop.permute.xlu0 %2042 }
 0xe52   :  { %2921 = vmatprep.subr.mxu0 %v1796_v54 }
 0xe53   :  { %v3048_v55 = vpop.eup %3047  ;;  %2922 = vmatpush3.msra.mxu0 %v1796_v54 }
 0xe54   :  { %v1791_v56 = vmul.f32 %v3048_v55, %v3040_v34 }
 0xe55   :  { %v1794_v57 = vpop.permute.xlu1 %1793 }
 0xe56   :  { %2923 = vmatprep.subr.mxu0 %v1794_v57  ;;  %2925 = vmatprep.mubr.msk.f32.mxu0 %vm301_vm2, %v1791_v56 }
 0xe57   :  { %v3050_v58 = vpop.eup %3049  ;;  %2924 = vmatpush3.msra.mxu0 %v1794_v57 }
 0xe58   :  { %2928 = vmatprep.subr.mxu0 %v3365_v46  ;;  %v1792_v25 = vmul.f32 %v3050_v58, %v3042_v36 }
 0xe59   :  { %v2047_v43 = vpop.permute.xlu1 %2046 }
 0xe5a   :  { %2926 = vmatmul.mubr.msk.f32.vlgmr.msra.gmra.mxu0 %vm301_vm2, %v1792_v25 }
 0xe5b   :  { %2929 = vmatpush3.msra.mxu0 %v3365_v46  ;;  %v2332_v46 = vpop.permute.xlu0 %2331 }
 0xe5c   :  { %2938 = vmatprep.subr.msk.mxu0 %vm217_vm1, %v2049_v27 }
 0xe5d   :  { %v2045_v4 = vpop.permute.xlu1 %2044 }
 0xe5f   :  { %v2326_v5 = vpop.permute.xlu0 %2325 }
 0xe61   :  { %v2330_v6 = vpop.permute.xlu1 %2329 }
 0xe65   :  { %v2328_v7 = vpop.permute.xlu1 %2327 }
 0xf10   :  { %v2913_v39 = vpop.f32.mrf.mxu0 }
 0xf12   :  { %v1671_v61 = vpop.f32.mrf.mxu0 }
 0xf13   :  { %2935 = vmatprep.mubr.msk.f32.mxu1 %vm217_vm1, %v1671_v61 }
 0xf14   :  { %2936 = vmatmul.mubr.msk.f32.vlgmr.msra.gmra.mxu1 %vm217_vm1, %v2913_v39 }
 0xf1a   :  { %v2927_v14 = vpop.f32.mrf.mxu0 }
 0xf1c   :  { %v1871_v3 = vpop.f32.mrf.mxu0 }
 0xf1d   :  { %2930 = vmatprep.mubr.msk.f32.mxu0 %vm217_vm1, %v1871_v3 }
 0xf1e   :  { %2931 = vmatmul.mubr.msk.f32.vlgmr.msra.gmra.mxu0 %vm217_vm1, %v2927_v14 }
 0xf1f   :  { %2939 = vmatpush3.xpose.msk.msra.mxu0 %vm217_vm1, %v2049_v27  ;;  %2942 = vmatprep.mubr.msk.f32.mxu0 %vm217_vm1, %v2043_v41 }
 0xf20   :  { %2940 = vmatprep.subr.msk.mxu0 %vm217_vm1, %v2047_v43 }
 0xf23   :  { %2941 = vmatpush3.xpose.msk.msra.mxu0 %vm217_vm1, %v2047_v43 }
 0xf24   :  { %2957 = vmatprep.subr.msk.mxu0 %vm217_vm1, %v2332_v46 }
 0xf26   :  { %2943 = vmatmul.mubr.msk.f32.vlgmr.msra.gmra.mxu0 %vm217_vm1, %v2045_v4 }
 0xf27   :  { %2958 = vmatpush3.xpose.msk.msra.mxu0 %vm217_vm1, %v2332_v46  ;;  %2961 = vmatprep.mubr.msk.f32.mxu0 %vm217_vm1, %v2326_v5 }
 0xf28   :  { %2959 = vmatprep.subr.msk.mxu0 %vm217_vm1, %v2330_v6 }
 0xf2b   :  { %2960 = vmatpush3.xpose.msk.msra.mxu0 %vm217_vm1, %v2330_v6 }
 0xf2e   :  { %2962 = vmatmul.mubr.msk.f32.vlgmr.msra.gmra.mxu0 %vm217_vm1, %v2328_v7 }
 0xfd4   :  { %v2937_v16 = vpop.f32.mrf.mxu1 }
 0xfd6   :  { %v2033_v27 = vpop.f32.mrf.mxu1 }
 0xfde   :  { %v2932_v8 = vpop.f32.mrf.mxu0 }
 0xfdf   :  { %v3564_v9 = vadd.f32 %v2937_v16, %v2932_v8 }
 0xfe0   :  { %v3566_v11 = vpop.f32.mrf.mxu0 }
 0xfe1   :  { %v2034_v4 = vadd.f32 %v2033_v27, %v3566_v11 }
 0xfe6   :  { %v2944_v12 = vpop.f32.mrf.mxu0 }
 0xfe7   :  { %v2130_v21 = vadd.f32 %v2944_v12, %v3320_v50 }
 0xfe8   :  { %v2124_v13 = vpop.f32.mrf.mxu0 }
 0xfe9   :  { %v2125_v62 = vadd.f32 %v2124_v13, %v3322_v52  ;;  %v2136_v18 = vsel %vm301_vm2, %v2130_v21, -inf }
 0xfea   :  { %2137 = vmax.xlane.f32.xlu1 %v2136_v18 }
 0xfeb   :  { %v2133_v19 = vsel %vm301_vm2, %v2125_v62, -inf }
 0xfec   :  { %2134 = vmax.xlane.f32.xlu0 %v2133_v19 }
 0xfee   :  { %v2963_v17 = vpop.f32.mrf.mxu0 }
 0xfef   :  { %v2413_v38 = vadd.f32 %v2963_v17, %v3320_v50 }
 0xff0   :  { %v2407_v63 = vpop.f32.mrf.mxu0 }
 0xff1   :  { %v2408_v23 = vadd.f32 %v2407_v63, %v3322_v52  ;;  %v2419_v40 = vsel %vm301_vm2, %v2413_v38, -inf }
 0xff3   :  { %v2416_v24 = vsel %vm301_vm2, %v2408_v23, -inf }
 0xffb   :  { %2155 = vrot.lane.b32.xlu1 %v3476_v60, %s3191_s22 }
0x101f   :  { %2417 = vmax.xlane.f32.xlu1 %v2416_v24 }
0x1073   :  { %v2138_v26 = vpop.xlane.xlu1 %2137 }
0x1074   :  { %v2140_v28 = vsub.f32 %v2130_v21, %v2138_v26 }
0x1075   :  { %v2135_v29 = vpop.xlane.xlu0 %2134 }
0x1076   :  { %v2143_v1 = vmul.f32 1.442695, %v2140_v28  ;;  %v2139_v30 = vsub.f32 %v2125_v62, %v2135_v29 }
0x1077   :  { %v2156_v52 = vpop.permute.xlu1 %2155 }
0x1078   :  { %3051 = vpow2.f32 %v2143_v1  ;;  %v2141_v31 = vmul.f32 1.442695, %v2139_v30 }
0x107a   :  { %3053 = vpow2.f32 %v2141_v31 }
0x1085   :  { %v3052_v0 = vpop.eup %3051 }
0x1086   :  { %v2148_v32 = vsel %vm301_vm2, %v3052_v0, 0.0 }
0x1087   :  { %v3054_v33 = vpop.eup %3053  ;;  %2149 = vadd.xlane.f32.xlu0 %v2148_v32 }
0x1088   :  { %v2145_v34 = vsel %vm301_vm2, %v3054_v33, 0.0 }
0x108b   :  { %2146 = vadd.xlane.f32.xlu0 %v2145_v34 }
0x10a1   :  { %2157 = vrot.lane.b32.xlu0 %v3473_v59, %s3191_s22 }
0x10a8   :  { %v2418_v35 = vpop.xlane.xlu1 %2417 }
0x10a9   :  { %v2422_v36 = vsub.f32 %v2408_v23, %v2418_v35 }
0x10ab   :  { %v2424_v37 = vmul.f32 1.442695, %v2422_v36 }
0x10ad   :  { %3055 = vpow2.f32 %v2424_v37 }
0x10ba   :  { %v3056_v42 = vpop.eup %3055 }
0x10bb   :  { %v2428_v44 = vsel %vm301_vm2, %v3056_v42, 0.0 }
0x10c0   :  { %2420 = vmax.xlane.f32.xlu0 %v2419_v40 }
0x10c4   :  { %2429 = vadd.xlane.f32.xlu0 %v2428_v44 }
0x10da   :  { %2440 = vrot.lane.b32.xlu0 %v3473_v59, %s3192_s23 }
0x1110   :  { %v2150_v45 = vpop.xlane.xlu0 %2149 }
0x1111   :  { %3057 = vrcp.f32 %v2150_v45 }
0x1114   :  { %v2147_v47 = vpop.xlane.xlu0 %2146 }
0x1115   :  { %3059 = vrcp.f32 %v2147_v47 }
0x1118   :  { %v2158_v15 = vpop.permute.xlu0 %2157 }
0x1119   :  { %2945 = vmatprep.subr.mxu1 %v2158_v15 }
0x111a   :  { %2946 = vmatpush3.msra.mxu1 %v2158_v15 }
0x111b   :  { %2947 = vmatprep.subr.mxu1 %v2156_v52 }
0x111c   :  { %2948 = vmatpush3.msra.mxu1 %v2156_v52 }
0x111d   :  { %2952 = vmatprep.subr.mxu1 %v3424_v53 }
0x111e   :  { %v3058_v50 = vpop.eup %3057 }
0x111f   :  { %v2154_v51 = vmul.f32 %v3058_v50, %v3052_v0 }
0x1122   :  { %v3060_v48 = vpop.eup %3059 }
0x1123   :  { %v2153_v49 = vmul.f32 %v3060_v48, %v3054_v33 }
0x1125   :  { %2949 = vmatprep.mubr.msk.f32.mxu1 %vm301_vm2, %v2153_v49 }
0x1126   :  { %2950 = vmatmul.mubr.msk.f32.vlgmr.msra.gmra.mxu1 %vm301_vm2, %v2154_v51 }
0x1127   :  { %2953 = vmatpush3.msra.mxu1 %v3424_v53 }
0x1149   :  { %v2421_v59 = vpop.xlane.xlu0 %2420 }
0x114a   :  { %v2423_v54 = vsub.f32 %v2413_v38, %v2421_v59 }
0x114c   :  { %v2426_v55 = vmul.f32 1.442695, %v2423_v54 }
0x114d   :  { %v2430_v56 = vpop.xlane.xlu0 %2429 }
0x114e   :  { %3061 = vpow2.f32 %v2426_v55 }
0x114f   :  { %3063 = vrcp.f32 %v2430_v56 }
0x1151   :  { %v2441_v57 = vpop.permute.xlu0 %2440 }
0x1152   :  { %2964 = vmatprep.subr.mxu1 %v2441_v57 }
0x115b   :  { %v3062_v58 = vpop.eup %3061 }
0x115c   :  { %v2431_v25 = vsel %vm301_vm2, %v3062_v58, 0.0  ;;  %v3064_v39 = vpop.eup %3063 }
0x115d   :  { %2432 = vadd.xlane.f32.xlu1 %v2431_v25  ;;  %v2436_v14 = vmul.f32 %v3064_v39, %v3056_v42 }
0x116e   :  { %2438 = vrot.lane.b32.xlu1 %v3476_v60, %s3192_s23 }
0x11e6   :  { %v2951_v61 = vpop.f32.mrf.mxu1  ;;  %v2433_v41 = vpop.xlane.xlu1 %2432 }
0x11e7   :  { %3065 = vrcp.f32 %v2433_v41 }
0x11e8   :  { %v2233_v53 = vpop.f32.mrf.mxu1 }
0x11e9   :  { %2954 = vmatprep.mubr.msk.f32.mxu1 %vm217_vm1, %v2233_v53 }
0x11ea   :  { %2955 = vmatmul.mubr.msk.f32.vlgmr.msra.gmra.mxu1 %vm217_vm1, %v2951_v61  ;;  %v2439_v43 = vpop.permute.xlu1 %2438 }
0x11eb   :  { %2965 = vmatpush3.msra.mxu1 %v2441_v57  ;;  %2968 = vmatprep.mubr.msk.f32.mxu1 %vm301_vm2, %v2436_v14 }
0x11ec   :  { %2966 = vmatprep.subr.mxu1 %v2439_v43 }
0x11ed   :  { %2967 = vmatpush3.msra.mxu1 %v2439_v43 }
0x11ee   :  { %2971 = vmatprep.subr.mxu1 %v3438_v2 }
0x11f4   :  { %v3066_v60 = vpop.eup %3065 }
0x11f5   :  { %v2437_v3 = vmul.f32 %v3066_v60, %v3062_v58 }
0x11f7   :  { %2969 = vmatmul.mubr.msk.f32.vlgmr.msra.gmra.mxu1 %vm301_vm2, %v2437_v3 }
0x11f8   :  { %2972 = vmatpush3.msra.mxu1 %v3438_v2 }
0x12aa   :  { %v2956_v46 = vpop.f32.mrf.mxu1 }
0x12ab   :  { %v2324_v5 = vadd.f32 %v2956_v46, %v3564_v9 }
0x12ac   :  { %v2314_v6 = vpop.f32.mrf.mxu1 }
0x12ad   :  { %v2323_v7 = vadd.f32 %v2314_v6, %v2034_v4 }
0x12b7   :  { %v2970_v16 = vpop.f32.mrf.mxu1 }
0x12b9   :  { %v2516_v8 = vpop.f32.mrf.mxu1 }
0x12ba   :  { %2973 = vmatprep.mubr.msk.f32.mxu1 %vm217_vm1, %v2516_v8 }
0x12bb   :  { %2974 = vmatmul.mubr.msk.f32.vlgmr.msra.gmra.mxu1 %vm217_vm1, %v2970_v16 }
0x137b   :  { %v2975_v12 = vpop.f32.mrf.mxu1 }
0x137c   :  { %v2607_v21 = vadd.f32 %v2975_v12, %v2324_v5 }
0x137d   :  { %v2597_v13 = vpop.f32.mrf.mxu1 }
0x137e   :  { %v2609_v62 = vadd.f32 %v2607_v21, %v3448_v10  ;;  %v2606_v18 = vadd.f32 %v2597_v13, %v2323_v7 }
0x1380   :  { %v2611_v2 = vadd.f32 %v2609_v62, %v3452_v20  ;;  %v2608_v9 = vadd.f32 %v2606_v18, %v3448_v10 }
0x1382   :  { %2613 = vst.msk [vmem:[#allocation10 + $0x8] sm:$0xff] %vm84_vm0, %v2611_v2  ;;  %v2610_v11 = vadd.f32 %v2608_v9, %v3456_v22 }
0x1384   :  { %2612 = vst.msk [vmem:[#allocation10] sm:$0xff] %vm84_vm0, %v2610_v11 }
0x1385   :  { %3158 = shalt.err (!%p3155_p10)
}
0x1386   :  { %2625 = dma.vmem_to_hbm [thread:$0]  %s2620_s25, 256, %s3619_s5, [#allocation4], %s3177_s26, %s3177_s26, %s3178_s27  }
0x1387   :  { %3173 = dma.done.wait [#allocation4], 256  }
0x1388   :  { %3174 = vsyncadd [#allocation4], 4294967040 }
0x1389   :  { %2629 = vsyncpa [#allocation3], 1 }
0x138a   :  { %2630 = vsyncpa [#allocation6], 1 }
0x138b   :  { %2631 = vsyncpa [#allocation9], 1 }
0x138c   :  { %2632 = vsyncpa [#allocation4], 1 }

</bundles_post_ra>
